<compile_context>
chip_gen: v5e
topology: v5e:2x2
jax: 0.10.0
libtpu: 0.0.40
codegen_flags: <defaults>
</compile_context>

<pallas_src>
import numpy as np

import jax
import jax.numpy as jnp
from jax import lax
from jax.experimental import pallas as pl
from jax.experimental.pallas import tpu as pltpu


# ---------------- device / VMEM budget helpers ----------------

_VMEM_LIMIT_CACHE = []


def _vmem_limit():
    """Scoped-VMEM limit: ~75% of physical VMEM, capped at 96 MiB.
    -> ~48 MiB on v7x (64 MiB / TC), 96 MiB on v5e / v6e (128 MiB)."""
    if not _VMEM_LIMIT_CACHE:
        try:
            cap = int(pltpu.get_tpu_info().vmem_capacity_bytes)
            lim = max(16 * 1024 * 1024, min(cap * 3 // 4, 96 * 1024 * 1024))
        except Exception:
            lim = 64 * 1024 * 1024
        _VMEM_LIMIT_CACHE.append(lim)
    return _VMEM_LIMIT_CACHE[0]


def _compiler_params(dim_sem):
    return pltpu.CompilerParams(dimension_semantics=dim_sem,
                                vmem_limit_bytes=_vmem_limit())


def _choose_batch_block(B, per_item_bytes, resident_bytes, budget):
    """Largest divisor of B whose per-grid-step VMEM estimate fits the budget.
    When the whole batch fits and B >= 4, keep >=2 batch blocks so v7x's second
    TensorCore gets work on the 'parallel' axis (weight DMA is still amortized >=B/2 x)."""
    best = 1
    for cand in range(1, B + 1):
        if B % cand == 0 and resident_bytes + cand * per_item_bytes <= budget:
            best = cand
    if best == B and B >= 4:
        halves = [d for d in range(1, B) if B % d == 0 and 2 * d <= B]
        if halves:
            best = max(halves)
    return best


# ---------------- in-kernel math helpers ----------------

_TRANS_B = (((1,), (1,)), ((), ()))   # contract last dim of both operands (QK^T w/o transpose)


def _layernorm(x, w, b, eps=1e-5):
    mu = jnp.mean(x, axis=-1, keepdims=True)
    xc = x - mu
    var = jnp.mean(xc * xc, axis=-1, keepdims=True)
    inv = lax.rsqrt(var + eps)
    return xc * inv * w + b


def _erf(x):
    # Numerical-Recipes erfc approximation (~1.2e-7 abs error ~ f32 eps): exact (erf-based)
    # torch.nn.functional.gelu semantics via exp on the EUP.
    a = jnp.abs(x)
    t = 1.0 / (1.0 + 0.5 * a)
    poly = -1.26551223 + t * (1.00002368 + t * (0.37409196 + t * (0.09678418 +
           t * (-0.18628806 + t * (0.27886807 + t * (-1.13520398 + t * (1.48851587 +
           t * (-0.82215223 + t * 0.17087277))))))))
    erfc = t * jnp.exp(-a * a + poly)
    return jnp.where(x >= 0.0, 1.0 - erfc, erfc - 1.0)


def _gelu_exact(x):
    return 0.5 * x * (1.0 + _erf(x * 0.7071067811865476))


def _softmax_last(x):
    m = jnp.max(x, axis=-1, keepdims=True)
    e = jnp.exp(x - m)
    # reciprocal goes to the EUP slot instead of a VALU divide
    return e * pl.reciprocal(jnp.sum(e, axis=-1, keepdims=True), approx=True)


def _mha_rows(qn, ctxn, wq, wkv, wo, bo, heads, dim_head, nq, nc, n_items, cdt):
    """Multi-head attention on batch-flattened, already-normed 2D row tiles.

    qn: (n_items*nq, q_in) f32, ctxn: (n_items*nc, c_in) f32 -> (n_items*nq, out_dim) f32.
      * all projections (to_q / to_kv / to_out) run on the flat row tile (MXU sees
        n_items*tokens rows); only softmax(QK^T)V is per batch element / per head.
      * 1/sqrt(dim_head) is already folded into wq host-side.
      * QK^T uses dot_general trans_b (no K transpose / no XLU relayout).
      * head outputs concatenated as values (lane-dense) before one to_out matmul.
    """
    inner = heads * dim_head
    qn_c = qn.astype(cdt)
    ctxn_c = qn_c if ctxn is qn else ctxn.astype(cdt)      # hoist duplicate cast (self-attn)
    q = jnp.dot(qn_c, wq, preferred_element_type=jnp.float32).astype(cdt)
    kv = jnp.dot(ctxn_c, wkv, preferred_element_type=jnp.float32)
    k = kv[:, :inner].astype(cdt)
    v = kv[:, inner:].astype(cdt)

    outs = []
    for b in range(n_items):                               # static, unrolled
        qb = q[b * nq:(b + 1) * nq, :]
        kb = k[b * nc:(b + 1) * nc, :]
        vb = v[b * nc:(b + 1) * nc, :]
        head_outs = []
        for h in range(heads):                             # static lane offsets
            lo, hi = h * dim_head, (h + 1) * dim_head
            sim = lax.dot_general(qb[:, lo:hi], kb[:, lo:hi], _TRANS_B,
                                  preferred_element_type=jnp.float32)
            attn = _softmax_last(sim).astype(cdt)
            head_outs.append(jnp.dot(attn, vb[:, lo:hi],
                                     preferred_element_type=jnp.float32))
        outs.append(head_outs[0] if heads == 1
                    else jnp.concatenate(head_outs, axis=-1))
    oh = outs[0] if n_items == 1 else jnp.concatenate(outs, axis=0)
    return jnp.dot(oh.astype(cdt), wo, preferred_element_type=jnp.float32) + bo


def _geglu_ff(xn, w1, b1, w2, b2, hidden, cdt):
    h = jnp.dot(xn.astype(cdt), w1, preferred_element_type=jnp.float32) + b1
    val = h[:, :hidden]                        # torch GEGLU: first half = value,
    gates = h[:, hidden:]                      #              second half = gates
    y = val * _gelu_exact(gates)
    return jnp.dot(y.astype(cdt), w2, preferred_element_type=jnp.float32) + b2


# ---------------- Pallas kernels ----------------

def make_encoder_stack_kernel(heads, dim_head, hidden, num_layers, cdt,
                              bblk, n_tok, dim, out_dim, fuse_logits):
    rows = bblk * n_tok

    def kernel(x_ref,
               a_lnw, a_lnb, a_wq, a_wkv, a_wo, a_bo,
               f_lnw, f_lnb, w1, b1, w2, b2, *rest):
        if fuse_logits:
            wl, bl, o_ref, carry_ref = rest
        else:
            o_ref, carry_ref = rest
        layer = pl.program_id(1)

        @pl.when(layer == 0)
        def _():
            carry_ref[...] = x_ref[...].reshape(rows, dim).astype(jnp.float32)

        x = carry_ref[...]
        xn = _layernorm(x, a_lnw[...], a_lnb[...])
        x = x + _mha_rows(xn, xn, a_wq[...], a_wkv[...], a_wo[...], a_bo[...],
                          heads, dim_head, n_tok, n_tok, bblk, cdt)      # PreNorm attn + res
        xn = _layernorm(x, f_lnw[...], f_lnb[...])
        x = x + _geglu_ff(xn, w1[...], b1[...], w2[...], b2[...], hidden, cdt)  # FF + res
        carry_ref[...] = x

        @pl.when(layer == num_layers - 1)
        def _():
            if fuse_logits:
                y = jnp.dot(x.astype(cdt), wl[...],
                            preferred_element_type=jnp.float32) + bl[...]
                o_ref[...] = y.reshape(bblk, n_tok, out_dim).astype(o_ref.dtype)
            else:
                o_ref[...] = x.reshape(bblk, n_tok, out_dim).astype(o_ref.dtype)

    return kernel


def make_decoder_cross_kernel(cross_heads, cross_dh, latent_heads, latent_dh, hidden, cdt,
                              bblk, m_tok, n_tok, qdim, dim, out_dim, fuse_logits):
    def kernel(q_ref, c_ref,
               c_lnqw, c_lnqb, c_lncw, c_lncb, c_wq, c_wkv, c_wo, c_bo,
               a_lnw, a_lnb, a_wq, a_wkv, a_wo, a_bo,
               f_lnw, f_lnb, w1, b1, w2, b2, *rest):
        if fuse_logits:
            wl, bl, o_ref = rest
        else:
            (o_ref,) = rest
        qn = _layernorm(q_ref[...].reshape(bblk * m_tok, qdim).astype(jnp.float32),
                        c_lnqw[...], c_lnqb[...])
        cn = _layernorm(c_ref[...].reshape(bblk * n_tok, dim).astype(jnp.float32),
                        c_lncw[...], c_lncb[...])
        x = _mha_rows(qn, cn, c_wq[...], c_wkv[...], c_wo[...], c_bo[...],
                      cross_heads, cross_dh, m_tok, n_tok, bblk, cdt)    # cross-attn (no res)
        xn = _layernorm(x, a_lnw[...], a_lnb[...])
        x = x + _mha_rows(xn, xn, a_wq[...], a_wkv[...], a_wo[...], a_bo[...],
                          latent_heads, latent_dh, m_tok, m_tok, bblk, cdt)  # self-attn + res
        xn = _layernorm(x, f_lnw[...], f_lnb[...])
        x = x + _geglu_ff(xn, w1[...], b1[...], w2[...], b2[...], hidden, cdt)
        if fuse_logits:
            x = jnp.dot(x.astype(cdt), wl[...],
                        preferred_element_type=jnp.float32) + bl[...]
        o_ref[...] = x.reshape(bblk, m_tok, out_dim).astype(o_ref.dtype)

    return kernel


# ---------------- pallas_call wrappers ----------------

def encoder_stack_block(x, stacked, heads, dim_head, hidden, cdt, *,
                        logits_p=None, logits_dim=None, batch_block=None):
    """All (self-attn + FF) layers of a stack in a single pallas_call.
    grid=(B//Bblk, layer); activation carried in VMEM across the layer axis; optionally
    fuses the final logits projection into the last layer's grid step."""
    B, N, D = x.shape
    num_layers = stacked[0].shape[0]
    inner = heads * dim_head
    fuse = logits_p is not None
    out_dim = logits_dim if fuse else D

    # per-grid-step resident bytes: double-buffered per-layer weight block (+ fused logits)
    wbytes = 2 * sum(int(np.prod(p.shape[1:])) * p.dtype.itemsize for p in stacked)
    if fuse:
        wbytes += 2 * sum(int(p.size) * p.dtype.itemsize for p in logits_p)
    # per batch element: dbl-buffered in/out blocks + carry + q/kv/ff transients (f32)
    per_item = 4 * N * (2 * D + 2 * out_dim + D + 3 * inner + 2 * hidden + 4 * D)
    if batch_block is not None:
        assert B % batch_block == 0
        bblk = batch_block
    else:
        bblk = _choose_batch_block(B, per_item, wbytes, _vmem_limit())

    kernel = make_encoder_stack_kernel(heads, dim_head, hidden, num_layers, cdt,
                                       bblk, N, D, out_dim, fuse)
    in_specs = [pl.BlockSpec((bblk, N, D), lambda b, l: (b, 0, 0))]
    for p in stacked:                      # per-layer weights streamed along the layer axis
        in_specs.append(pl.BlockSpec((None,) + p.shape[1:], lambda b, l: (l, 0, 0)))
    args = [x, *stacked]
    if fuse:
        for p in logits_p:                 # grid-invariant logits weights
            in_specs.append(pl.BlockSpec(p.shape, lambda b, l, nd=p.ndim: (0,) * nd))
        args += list(logits_p)

    return pl.pallas_call(
        kernel,
        grid=(B // bblk, num_layers),
        in_specs=in_specs,
        out_specs=pl.BlockSpec((bblk, N, out_dim), lambda b, l: (b, 0, 0)),
        out_shape=jax.ShapeDtypeStruct((B, N, out_dim), x.dtype),
        scratch_shapes=[pltpu.VMEM((bblk * N, D), jnp.float32)],   # activation carry
        compiler_params=_compiler_params(("parallel", "arbitrary")),
    )(*args)


def decoder_cross_block(queries, ctx, cross_p, attn_p, ff_p, cfg, hidden, cdt, *,
                        logits_p=None, batch_block=None):
    B, M, QD = queries.shape
    _, N, D = ctx.shape
    fuse = logits_p is not None
    out_dim = cfg["logits_dim"] if fuse else D
    cross_inner = cfg["cross_heads"] * cfg["cross_dim_head"]
    latent_inner = cfg["latent_heads"] * cfg["latent_dim_head"]

    weights = list(cross_p) + list(attn_p) + list(ff_p) + (list(logits_p) if fuse else [])
    wbytes = 2 * sum(int(p.size) * p.dtype.itemsize for p in weights)
    per_item = 4 * (2 * M * QD + 2 * N * D + 2 * M * out_dim
                    + M * (3 * latent_inner + 2 * hidden + 4 * D + N)
                    + N * (2 * cross_inner + D))
    if batch_block is not None:
        assert B % batch_block == 0
        bblk = batch_block
    else:
        bblk = _choose_batch_block(B, per_item, wbytes, _vmem_limit())

    kernel = make_decoder_cross_kernel(cfg["cross_heads"], cfg["cross_dim_head"],
                                       cfg["latent_heads"], cfg["latent_dim_head"],
                                       hidden, cdt, bblk, M, N, QD, D, out_dim, fuse)
    in_specs = [pl.BlockSpec((bblk, M, QD), lambda b: (b, 0, 0)),
                pl.BlockSpec((bblk, N, D), lambda b: (b, 0, 0))]
    in_specs += [pl.BlockSpec(p.shape, lambda b, nd=p.ndim: (0,) * nd) for p in weights]

    return pl.pallas_call(
        kernel,
        grid=(B // bblk,),
        in_specs=in_specs,
        out_specs=pl.BlockSpec((bblk, M, out_dim), lambda b: (b, 0, 0)),
        out_shape=jax.ShapeDtypeStruct((B, M, out_dim), queries.dtype),
        compiler_params=_compiler_params(("parallel",)),
    )(queries, ctx, *weights)


# ---------------- parameters (deterministic, synthetic) ----------------

def init_params(key, *, encoder_depth=2, decoder_depth=1, dim=128, queries_dim=96,
                logits_dim=32, decode_cross_every=1, cross_heads=1, latent_heads=8,
                cross_dim_head=64, latent_dim_head=64, ff_mult=4):
    keys = iter(jax.random.split(key, 512))

    def linear(fan_in, fan_out, bias=True):
        w = jax.random.normal(next(keys), (fan_in, fan_out), jnp.float32) * (fan_in ** -0.5)
        if bias:
            return w, jnp.zeros((1, fan_out), jnp.float32)
        return w

    def self_attn_params(d, heads, dh):
        inner = heads * dh
        return (jnp.ones((1, d), jnp.float32), jnp.zeros((1, d), jnp.float32),
                linear(d, inner, bias=False), linear(d, inner * 2, bias=False),
                *linear(inner, d, bias=True))

    def cross_attn_params(qd, cd, od, heads, dh):
        inner = heads * dh
        return (jnp.ones((1, qd), jnp.float32), jnp.zeros((1, qd), jnp.float32),
                jnp.ones((1, cd), jnp.float32), jnp.zeros((1, cd), jnp.float32),
                linear(qd, inner, bias=False), linear(cd, inner * 2, bias=False),
                *linear(inner, od, bias=True))

    def ff_params(d, mult):
        return (jnp.ones((1, d), jnp.float32), jnp.zeros((1, d), jnp.float32),
                *linear(d, d * mult * 2), *linear(d * mult, d))

    def stack(layer_tuples):
        return tuple(jnp.stack([lay[i] for lay in layer_tuples], axis=0)
                     for i in range(len(layer_tuples[0])))

    has_decoder = decoder_depth > 0 and queries_dim is not None and queries_dim > 0
    enc_layers = [self_attn_params(dim, latent_heads, latent_dim_head)
                  + ff_params(dim, ff_mult) for _ in range(encoder_depth)]
    encoder_stack = stack(enc_layers)

    dec = []
    if has_decoder:
        for i in range(decoder_depth):
            if i % decode_cross_every == 0:
                dec.append(("cross",
                            cross_attn_params(queries_dim, dim, dim,
                                              cross_heads, cross_dim_head),
                            self_attn_params(dim, latent_heads, latent_dim_head),
                            ff_params(dim, ff_mult)))
            else:
                dec.append(("self",
                            stack([self_attn_params(dim, latent_heads, latent_dim_head)
                                   + ff_params(dim, ff_mult)])))
    wl, bl = linear(dim, logits_dim)
    cfg = dict(dim=dim, queries_dim=queries_dim, logits_dim=logits_dim,
               cross_heads=cross_heads, latent_heads=latent_heads,
               cross_dim_head=cross_dim_head, latent_dim_head=latent_dim_head,
               ff_mult=ff_mult, has_decoder=has_decoder)
    return dict(cfg=cfg, encoder_stack=encoder_stack, decoder_layers=dec,
                logits=(wl, bl))


# ---------------- host-side weight prep (scale folding + optional bf16 cast) ----------------

# matmul-weight indices inside each parameter tuple (only these are cast to bf16;
# LayerNorm params and biases stay f32).  scale_idx marks Wq for 1/sqrt(dh) folding.
_ENC_MM_IDX, _ENC_WQ_IDX = (2, 3, 4, 8, 10), 2     # (attn: wq, wkv, wo) + (ff: w1, w2)
_CROSS_MM_IDX, _CROSS_WQ_IDX = (4, 5, 6), 4
_ATTN_MM_IDX, _ATTN_WQ_IDX = (2, 3, 4), 2
_FF_MM_IDX = (2, 4)
_LOGITS_MM_IDX = (0,)


def _prep_weights(ps, mm_idx, cdt, scale_idx=None, scale=None):
    cast = np.dtype(cdt) != np.dtype('float32')
    out = []
    for i, p in enumerate(ps):
        if scale_idx is not None and i == scale_idx:
            p = p * scale                           # fold 1/sqrt(dim_head) into Wq once
        if cast and i in mm_idx:
            p = p.astype(cdt)                       # host-side cast -> halved weight DMA
        out.append(p)
    return tuple(out)


# ---------------- forward (mirrors TransformerEncoderDecoder.forward) ----------------

def transformer_encoder_decoder_forward(params, x, mask=None, queries=None,
                                        matmul_dtype=jnp.float32, batch_block=None):
    # TODO(synk): attention-mask path (masked_fill with -finfo.max) not implemented;
    #             this forward assumes mask=None (as in the example run).
    # TODO(synk): for long sequences, add flash-style K/V token tiling inside the fused
    #             kernels; demo shapes keep the full (N, N) sim tile comfortably in VMEM.
    assert mask is None
    cfg = params["cfg"]
    dim = cfg["dim"]
    hidden = dim * cfg["ff_mult"]
    cdt = np.dtype(matmul_dtype)
    b = x.shape[0]
    scale_lat = cfg["latent_dim_head"] ** (-0.5)
    scale_crs = cfg["cross_dim_head"] ** (-0.5)

    logits_p = _prep_weights(params["logits"], _LOGITS_MM_IDX, cdt)
    has_dec = (queries is not None) and cfg["has_decoder"]

    enc = _prep_weights(params["encoder_stack"], _ENC_MM_IDX, cdt, _ENC_WQ_IDX, scale_lat)
    x = encoder_stack_block(x, enc, cfg["latent_heads"], cfg["latent_dim_head"], hidden, cdt,
                            logits_p=None if has_dec else logits_p,
                            logits_dim=cfg["logits_dim"], batch_block=batch_block)
    if not has_dec:
        return x                                    # logits fused into the last encoder step

    if queries.ndim == 2:
        queries = jnp.broadcast_to(queries[None], (b,) + queries.shape)

    n_dec = len(params["decoder_layers"])
    for i, layer in enumerate(params["decoder_layers"]):
        last = (i == n_dec - 1)
        if layer[0] == "cross":
            cross_p = _prep_weights(layer[1], _CROSS_MM_IDX, cdt, _CROSS_WQ_IDX, scale_crs)
            attn_p = _prep_weights(layer[2], _ATTN_MM_IDX, cdt, _ATTN_WQ_IDX, scale_lat)
            ff_p = _prep_weights(layer[3], _FF_MM_IDX, cdt)
            x = decoder_cross_block(queries, x, cross_p, attn_p, ff_p, cfg, hidden, cdt,
                                    logits_p=logits_p if last else None,
                                    batch_block=batch_block)
        else:
            stacked = _prep_weights(layer[1], _ENC_MM_IDX, cdt, _ENC_WQ_IDX, scale_lat)
            x = encoder_stack_block(x, stacked, cfg["latent_heads"], cfg["latent_dim_head"],
                                    hidden, cdt,
                                    logits_p=logits_p if last else None,
                                    logits_dim=cfg["logits_dim"], batch_block=batch_block)
        if last:
            return x                                # logits fused into the last decoder step
    return x


# ---------------- demo ----------------

if __name__ == "__main__":
    key = jax.random.PRNGKey(0)
    k_par, k_x, k_q = jax.random.split(key, 3)

    # small configuration consistent with the module's constructor
    # (demo shapes are intentionally tiny; last dims < 128 are non-representative for perf)
    dim, queries_dim, logits_dim = 32, 16, 8
    params = init_params(k_par, encoder_depth=2, decoder_depth=1, dim=dim,
                         queries_dim=queries_dim, logits_dim=logits_dim,
                         decode_cross_every=1, cross_heads=1, latent_heads=4,
                         cross_dim_head=8, latent_dim_head=8)

    B, N, M = 2, 8, 6
    x = jax.random.normal(k_x, (B, N, dim), jnp.float32)             # (b, n, dim)
    queries = jax.random.normal(k_q, (M, queries_dim), jnp.float32)  # 2-D -> repeated over batch

    out = jax.block_until_ready(
        transformer_encoder_decoder_forward(params, x, queries=queries))
    assert out.shape == (B, M, logits_dim) and out.dtype == jnp.float32
    assert bool(jnp.isfinite(out).all())

    # encoder-only path (queries=None), logits fused into the last encoder grid step
    out_enc = jax.block_until_ready(transformer_encoder_decoder_forward(params, x))
    assert out_enc.shape == (B, N, logits_dim)
    assert bool(jnp.isfinite(out_enc).all())

    # mixed-precision path: bf16 MXU inputs / halved weight DMA, f32 statistics & accumulation
    out_bf16 = jax.block_until_ready(
        transformer_encoder_decoder_forward(params, x, queries=queries,
                                            matmul_dtype=jnp.bfloat16))
    assert out_bf16.shape == (B, M, logits_dim) and out_bf16.dtype == jnp.float32
    assert bool(jnp.isfinite(out_bf16).all())

    print("KERNEL_OK")
</pallas_src>

<mosaic_0001>
module attributes {stable_mosaic.version = 11 : i64} {
  func.func @kernel(%arg0: i32, %arg1: i32, %arg2: memref<2x8x32xf32, #tpu.memory_space<vmem>>, %arg3: memref<1x1x32xf32, #tpu.memory_space<vmem>>, %arg4: memref<1x1x32xf32, #tpu.memory_space<vmem>>, %arg5: memref<1x32x32xf32, #tpu.memory_space<vmem>>, %arg6: memref<1x32x64xf32, #tpu.memory_space<vmem>>, %arg7: memref<1x32x32xf32, #tpu.memory_space<vmem>>, %arg8: memref<1x1x32xf32, #tpu.memory_space<vmem>>, %arg9: memref<1x1x32xf32, #tpu.memory_space<vmem>>, %arg10: memref<1x1x32xf32, #tpu.memory_space<vmem>>, %arg11: memref<1x32x256xf32, #tpu.memory_space<vmem>>, %arg12: memref<1x1x256xf32, #tpu.memory_space<vmem>>, %arg13: memref<1x128x32xf32, #tpu.memory_space<vmem>>, %arg14: memref<1x1x32xf32, #tpu.memory_space<vmem>>, %arg15: memref<2x8x32xf32, #tpu.memory_space<vmem>>, %arg16: memref<16x32xf32, #tpu.memory_space<vmem>>) attributes {dimension_semantics = [#tpu.dimension_semantics<parallel>, #tpu.dimension_semantics<arbitrary>], iteration_bounds = array<i64: 1, 2>, scalar_prefetch = 0 : i64, scratch_operands = 1 : i64, tpu.core_type = #tpu.core_type<tc>, window_params = [{transform_indices = @transform_0, window_bounds = array<i64: 2, 8, 32>}, {transform_indices = @transform_1, window_bounds = array<i64: 1, 1, 32>}, {transform_indices = @transform_2, window_bounds = array<i64: 1, 1, 32>}, {transform_indices = @transform_3, window_bounds = array<i64: 1, 32, 32>}, {transform_indices = @transform_4, window_bounds = array<i64: 1, 32, 64>}, {transform_indices = @transform_5, window_bounds = array<i64: 1, 32, 32>}, {transform_indices = @transform_6, window_bounds = array<i64: 1, 1, 32>}, {transform_indices = @transform_7, window_bounds = array<i64: 1, 1, 32>}, {transform_indices = @transform_8, window_bounds = array<i64: 1, 1, 32>}, {transform_indices = @transform_9, window_bounds = array<i64: 1, 32, 256>}, {transform_indices = @transform_10, window_bounds = array<i64: 1, 1, 256>}, {transform_indices = @transform_11, window_bounds = array<i64: 1, 128, 32>}, {transform_indices = @transform_12, window_bounds = array<i64: 1, 1, 32>}, {transform_indices = @transform_13, window_bounds = array<i64: 2, 8, 32>}]} {
    %c0_i32 = arith.constant 0 : i32
    %0 = arith.cmpi eq, %arg1, %c0_i32 : i32
    %1 = arith.extui %0 : i1 to i32
    %c0_i32_0 = arith.constant 0 : i32
    %2 = arith.cmpi ne, %1, %c0_i32_0 : i32
    scf.if %2 {
      %c0_107 = arith.constant 0 : index
      %c0_108 = arith.constant 0 : index
      %c0_109 = arith.constant 0 : index
      %274 = vector.load %arg2[%c0_107, %c0_108, %c0_109] : memref<2x8x32xf32, #tpu.memory_space<vmem>>, vector<2x8x32xf32>
      %275 = vector.shape_cast %274 : vector<2x8x32xf32> to vector<16x32xf32>
      %c0_110 = arith.constant 0 : index
      %c0_111 = arith.constant 0 : index
      %276 = vector.load %arg16[%c0_110, %c0_111] : memref<16x32xf32, #tpu.memory_space<vmem>>, vector<16x32xf32>
      tpu.vector_store %arg16[%c0_110, %c0_111], %275 {strides = array<i32>} : memref<16x32xf32, #tpu.memory_space<vmem>>, vector<16x32xf32>,
    } else {
    }
    %c0 = arith.constant 0 : index
    %c0_1 = arith.constant 0 : index
    %3 = vector.load %arg16[%c0, %c0_1] : memref<16x32xf32, #tpu.memory_space<vmem>>, vector<16x32xf32>
    %c0_2 = arith.constant 0 : index
    %c0_3 = arith.constant 0 : index
    %c0_4 = arith.constant 0 : index
    %4 = vector.load %arg3[%c0_2, %c0_3, %c0_4] : memref<1x1x32xf32, #tpu.memory_space<vmem>>, vector<1x1x32xf32>
    %5 = vector.shape_cast %4 : vector<1x1x32xf32> to vector<1x32xf32>
    %c0_5 = arith.constant 0 : index
    %c0_6 = arith.constant 0 : index
    %c0_7 = arith.constant 0 : index
    %6 = vector.load %arg4[%c0_5, %c0_6, %c0_7] : memref<1x1x32xf32, #tpu.memory_space<vmem>>, vector<1x1x32xf32>
    %7 = vector.shape_cast %6 : vector<1x1x32xf32> to vector<1x32xf32>
    %cst = arith.constant dense<0.000000e+00> : vector<16xf32>
    %8 = vector.multi_reduction <add>, %3, %cst [1] : vector<16x32xf32> to vector<16xf32>
    %9 = vector.shape_cast %8 : vector<16xf32> to vector<16x1xf32>
    %cst_8 = arith.constant 3.200000e+01 : f32
    %10 = vector.broadcast %cst_8 : f32 to vector<16x1xf32>
    %11 = arith.divf %9, %10 : vector<16x1xf32>
    %12 = vector.broadcast %11 : vector<16x1xf32> to vector<16x32xf32>
    %13 = arith.subf %3, %12 : vector<16x32xf32>
    %14 = arith.mulf %13, %13 : vector<16x32xf32>
    %cst_9 = arith.constant dense<0.000000e+00> : vector<16xf32>
    %15 = vector.multi_reduction <add>, %14, %cst_9 [1] : vector<16x32xf32> to vector<16xf32>
    %16 = vector.shape_cast %15 : vector<16xf32> to vector<16x1xf32>
    %cst_10 = arith.constant 3.200000e+01 : f32
    %17 = vector.broadcast %cst_10 : f32 to vector<16x1xf32>
    %18 = arith.divf %16, %17 : vector<16x1xf32>
    %cst_11 = arith.constant 9.99999974E-6 : f32
    %19 = vector.broadcast %cst_11 : f32 to vector<16x1xf32>
    %20 = arith.addf %18, %19 : vector<16x1xf32>
    %21 = math.rsqrt %20 : vector<16x1xf32>
    %22 = vector.broadcast %21 : vector<16x1xf32> to vector<16x32xf32>
    %23 = arith.mulf %13, %22 : vector<16x32xf32>
    %24 = vector.broadcast %5 : vector<1x32xf32> to vector<16x32xf32>
    %25 = arith.mulf %23, %24 : vector<16x32xf32>
    %26 = vector.broadcast %7 : vector<1x32xf32> to vector<16x32xf32>
    %27 = arith.addf %25, %26 : vector<16x32xf32>
    %c0_12 = arith.constant 0 : index
    %c0_13 = arith.constant 0 : index
    %c0_14 = arith.constant 0 : index
    %28 = vector.load %arg5[%c0_12, %c0_13, %c0_14] : memref<1x32x32xf32, #tpu.memory_space<vmem>>, vector<1x32x32xf32>
    %29 = vector.shape_cast %28 : vector<1x32x32xf32> to vector<32x32xf32>
    %c0_15 = arith.constant 0 : index
    %c0_16 = arith.constant 0 : index
    %c0_17 = arith.constant 0 : index
    %30 = vector.load %arg6[%c0_15, %c0_16, %c0_17] : memref<1x32x64xf32, #tpu.memory_space<vmem>>, vector<1x32x64xf32>
    %31 = vector.shape_cast %30 : vector<1x32x64xf32> to vector<32x64xf32>
    %c0_18 = arith.constant 0 : index
    %c0_19 = arith.constant 0 : index
    %c0_20 = arith.constant 0 : index
    %32 = vector.load %arg7[%c0_18, %c0_19, %c0_20] : memref<1x32x32xf32, #tpu.memory_space<vmem>>, vector<1x32x32xf32>
    %33 = vector.shape_cast %32 : vector<1x32x32xf32> to vector<32x32xf32>
    %c0_21 = arith.constant 0 : index
    %c0_22 = arith.constant 0 : index
    %c0_23 = arith.constant 0 : index
    %34 = vector.load %arg8[%c0_21, %c0_22, %c0_23] : memref<1x1x32xf32, #tpu.memory_space<vmem>>, vector<1x1x32xf32>
    %35 = vector.shape_cast %34 : vector<1x1x32xf32> to vector<1x32xf32>
    %cst_24 = arith.constant dense<0.000000e+00> : vector<16x32xf32>
    %36 = tpu.matmul %27, %29, %cst_24 {dimension_numbers = #tpu.dot_dimension_numbers<[1], [0], [0], [1], [0, 0, 1, 1], [], []>} : vector<16x32xf32>, vector<32x32xf32>, vector<16x32xf32> -> vector<16x32xf32>
    %cst_25 = arith.constant dense<0.000000e+00> : vector<16x64xf32>
    %37 = tpu.matmul %27, %31, %cst_25 {dimension_numbers = #tpu.dot_dimension_numbers<[1], [0], [0], [1], [0, 0, 1, 1], [], []>} : vector<16x32xf32>, vector<32x64xf32>, vector<16x64xf32> -> vector<16x64xf32>
    %38 = vector.extract_strided_slice %37 {offsets = [0, 0], sizes = [16, 32], strides = [1, 1]} : vector<16x64xf32> to vector<16x32xf32>
    %39 = vector.extract_strided_slice %37 {offsets = [0, 32], sizes = [16, 32], strides = [1, 1]} : vector<16x64xf32> to vector<16x32xf32>
    %40 = vector.extract_strided_slice %36 {offsets = [0, 0], sizes = [8, 32], strides = [1, 1]} : vector<16x32xf32> to vector<8x32xf32>
    %41 = vector.extract_strided_slice %38 {offsets = [0, 0], sizes = [8, 32], strides = [1, 1]} : vector<16x32xf32> to vector<8x32xf32>
    %42 = vector.extract_strided_slice %39 {offsets = [0, 0], sizes = [8, 32], strides = [1, 1]} : vector<16x32xf32> to vector<8x32xf32>
    %43 = vector.extract_strided_slice %40 {offsets = [0, 0], sizes = [8, 8], strides = [1, 1]} : vector<8x32xf32> to vector<8x8xf32>
    %44 = vector.extract_strided_slice %41 {offsets = [0, 0], sizes = [8, 8], strides = [1, 1]} : vector<8x32xf32> to vector<8x8xf32>
    %cst_26 = arith.constant dense<0.000000e+00> : vector<8x8xf32>
    %45 = tpu.matmul %43, %44, %cst_26 {dimension_numbers = #tpu.dot_dimension_numbers<[1], [1], [0], [0], [0, 0, 1, 0], [], []>} : vector<8x8xf32>, vector<8x8xf32>, vector<8x8xf32> -> vector<8x8xf32>
    %cst_27 = arith.constant dense<0xFF800000> : vector<8xf32>
    %46 = vector.multi_reduction <maximumf>, %45, %cst_27 [1] : vector<8x8xf32> to vector<8xf32>
    %47 = vector.shape_cast %46 : vector<8xf32> to vector<8x1xf32>
    %48 = vector.broadcast %47 : vector<8x1xf32> to vector<8x8xf32>
    %49 = arith.subf %45, %48 : vector<8x8xf32>
    %50 = math.exp %49 : vector<8x8xf32>
    %cst_28 = arith.constant dense<0.000000e+00> : vector<8xf32>
    %51 = vector.multi_reduction <add>, %50, %cst_28 [1] : vector<8x8xf32> to vector<8xf32>
    %52 = vector.shape_cast %51 : vector<8xf32> to vector<8x1xf32>
    %53 = tpu.reciprocal %52 {approx = true} : vector<8x1xf32> -> vector<8x1xf32>
    %54 = vector.broadcast %53 : vector<8x1xf32> to vector<8x8xf32>
    %55 = arith.mulf %50, %54 : vector<8x8xf32>
    %56 = vector.extract_strided_slice %42 {offsets = [0, 0], sizes = [8, 8], strides = [1, 1]} : vector<8x32xf32> to vector<8x8xf32>
    %cst_29 = arith.constant dense<0.000000e+00> : vector<8x8xf32>
    %57 = tpu.matmul %55, %56, %cst_29 {dimension_numbers = #tpu.dot_dimension_numbers<[1], [0], [0], [1], [0, 0, 1, 1], [], []>} : vector<8x8xf32>, vector<8x8xf32>, vector<8x8xf32> -> vector<8x8xf32>
    %58 = vector.extract_strided_slice %40 {offsets = [0, 8], sizes = [8, 8], strides = [1, 1]} : vector<8x32xf32> to vector<8x8xf32>
    %59 = vector.extract_strided_slice %41 {offsets = [0, 8], sizes = [8, 8], strides = [1, 1]} : vector<8x32xf32> to vector<8x8xf32>
    %cst_30 = arith.constant dense<0.000000e+00> : vector<8x8xf32>
    %60 = tpu.matmul %58, %59, %cst_30 {dimension_numbers = #tpu.dot_dimension_numbers<[1], [1], [0], [0], [0, 0, 1, 0], [], []>} : vector<8x8xf32>, vector<8x8xf32>, vector<8x8xf32> -> vector<8x8xf32>
    %cst_31 = arith.constant dense<0xFF800000> : vector<8xf32>
    %61 = vector.multi_reduction <maximumf>, %60, %cst_31 [1] : vector<8x8xf32> to vector<8xf32>
    %62 = vector.shape_cast %61 : vector<8xf32> to vector<8x1xf32>
    %63 = vector.broadcast %62 : vector<8x1xf32> to vector<8x8xf32>
    %64 = arith.subf %60, %63 : vector<8x8xf32>
    %65 = math.exp %64 : vector<8x8xf32>
    %cst_32 = arith.constant dense<0.000000e+00> : vector<8xf32>
    %66 = vector.multi_reduction <add>, %65, %cst_32 [1] : vector<8x8xf32> to vector<8xf32>
    %67 = vector.shape_cast %66 : vector<8xf32> to vector<8x1xf32>
    %68 = tpu.reciprocal %67 {approx = true} : vector<8x1xf32> -> vector<8x1xf32>
    %69 = vector.broadcast %68 : vector<8x1xf32> to vector<8x8xf32>
    %70 = arith.mulf %65, %69 : vector<8x8xf32>
    %71 = vector.extract_strided_slice %42 {offsets = [0, 8], sizes = [8, 8], strides = [1, 1]} : vector<8x32xf32> to vector<8x8xf32>
    %cst_33 = arith.constant dense<0.000000e+00> : vector<8x8xf32>
    %72 = tpu.matmul %70, %71, %cst_33 {dimension_numbers = #tpu.dot_dimension_numbers<[1], [0], [0], [1], [0, 0, 1, 1], [], []>} : vector<8x8xf32>, vector<8x8xf32>, vector<8x8xf32> -> vector<8x8xf32>
    %73 = vector.extract_strided_slice %40 {offsets = [0, 16], sizes = [8, 8], strides = [1, 1]} : vector<8x32xf32> to vector<8x8xf32>
    %74 = vector.extract_strided_slice %41 {offsets = [0, 16], sizes = [8, 8], strides = [1, 1]} : vector<8x32xf32> to vector<8x8xf32>
    %cst_34 = arith.constant dense<0.000000e+00> : vector<8x8xf32>
    %75 = tpu.matmul %73, %74, %cst_34 {dimension_numbers = #tpu.dot_dimension_numbers<[1], [1], [0], [0], [0, 0, 1, 0], [], []>} : vector<8x8xf32>, vector<8x8xf32>, vector<8x8xf32> -> vector<8x8xf32>
    %cst_35 = arith.constant dense<0xFF800000> : vector<8xf32>
    %76 = vector.multi_reduction <maximumf>, %75, %cst_35 [1] : vector<8x8xf32> to vector<8xf32>
    %77 = vector.shape_cast %76 : vector<8xf32> to vector<8x1xf32>
    %78 = vector.broadcast %77 : vector<8x1xf32> to vector<8x8xf32>
    %79 = arith.subf %75, %78 : vector<8x8xf32>
    %80 = math.exp %79 : vector<8x8xf32>
    %cst_36 = arith.constant dense<0.000000e+00> : vector<8xf32>
    %81 = vector.multi_reduction <add>, %80, %cst_36 [1] : vector<8x8xf32> to vector<8xf32>
    %82 = vector.shape_cast %81 : vector<8xf32> to vector<8x1xf32>
    %83 = tpu.reciprocal %82 {approx = true} : vector<8x1xf32> -> vector<8x1xf32>
    %84 = vector.broadcast %83 : vector<8x1xf32> to vector<8x8xf32>
    %85 = arith.mulf %80, %84 : vector<8x8xf32>
    %86 = vector.extract_strided_slice %42 {offsets = [0, 16], sizes = [8, 8], strides = [1, 1]} : vector<8x32xf32> to vector<8x8xf32>
    %cst_37 = arith.constant dense<0.000000e+00> : vector<8x8xf32>
    %87 = tpu.matmul %85, %86, %cst_37 {dimension_numbers = #tpu.dot_dimension_numbers<[1], [0], [0], [1], [0, 0, 1, 1], [], []>} : vector<8x8xf32>, vector<8x8xf32>, vector<8x8xf32> -> vector<8x8xf32>
    %88 = vector.extract_strided_slice %40 {offsets = [0, 24], sizes = [8, 8], strides = [1, 1]} : vector<8x32xf32> to vector<8x8xf32>
    %89 = vector.extract_strided_slice %41 {offsets = [0, 24], sizes = [8, 8], strides = [1, 1]} : vector<8x32xf32> to vector<8x8xf32>
    %cst_38 = arith.constant dense<0.000000e+00> : vector<8x8xf32>
    %90 = tpu.matmul %88, %89, %cst_38 {dimension_numbers = #tpu.dot_dimension_numbers<[1], [1], [0], [0], [0, 0, 1, 0], [], []>} : vector<8x8xf32>, vector<8x8xf32>, vector<8x8xf32> -> vector<8x8xf32>
    %cst_39 = arith.constant dense<0xFF800000> : vector<8xf32>
    %91 = vector.multi_reduction <maximumf>, %90, %cst_39 [1] : vector<8x8xf32> to vector<8xf32>
    %92 = vector.shape_cast %91 : vector<8xf32> to vector<8x1xf32>
    %93 = vector.broadcast %92 : vector<8x1xf32> to vector<8x8xf32>
    %94 = arith.subf %90, %93 : vector<8x8xf32>
    %95 = math.exp %94 : vector<8x8xf32>
    %cst_40 = arith.constant dense<0.000000e+00> : vector<8xf32>
    %96 = vector.multi_reduction <add>, %95, %cst_40 [1] : vector<8x8xf32> to vector<8xf32>
    %97 = vector.shape_cast %96 : vector<8xf32> to vector<8x1xf32>
    %98 = tpu.reciprocal %97 {approx = true} : vector<8x1xf32> -> vector<8x1xf32>
    %99 = vector.broadcast %98 : vector<8x1xf32> to vector<8x8xf32>
    %100 = arith.mulf %95, %99 : vector<8x8xf32>
    %101 = vector.extract_strided_slice %42 {offsets = [0, 24], sizes = [8, 8], strides = [1, 1]} : vector<8x32xf32> to vector<8x8xf32>
    %cst_41 = arith.constant dense<0.000000e+00> : vector<8x8xf32>
    %102 = tpu.matmul %100, %101, %cst_41 {dimension_numbers = #tpu.dot_dimension_numbers<[1], [0], [0], [1], [0, 0, 1, 1], [], []>} : vector<8x8xf32>, vector<8x8xf32>, vector<8x8xf32> -> vector<8x8xf32>
    %103 = tpu.concatenate %57, %72, %87, %102 in 1 : vector<8x8xf32>, vector<8x8xf32>, vector<8x8xf32>, vector<8x8xf32> -> vector<8x32xf32>
    %104 = vector.extract_strided_slice %36 {offsets = [8, 0], sizes = [8, 32], strides = [1, 1]} : vector<16x32xf32> to vector<8x32xf32>
    %105 = vector.extract_strided_slice %38 {offsets = [8, 0], sizes = [8, 32], strides = [1, 1]} : vector<16x32xf32> to vector<8x32xf32>
    %106 = vector.extract_strided_slice %39 {offsets = [8, 0], sizes = [8, 32], strides = [1, 1]} : vector<16x32xf32> to vector<8x32xf32>
    %107 = vector.extract_strided_slice %104 {offsets = [0, 0], sizes = [8, 8], strides = [1, 1]} : vector<8x32xf32> to vector<8x8xf32>
    %108 = vector.extract_strided_slice %105 {offsets = [0, 0], sizes = [8, 8], strides = [1, 1]} : vector<8x32xf32> to vector<8x8xf32>
    %cst_42 = arith.constant dense<0.000000e+00> : vector<8x8xf32>
    %109 = tpu.matmul %107, %108, %cst_42 {dimension_numbers = #tpu.dot_dimension_numbers<[1], [1], [0], [0], [0, 0, 1, 0], [], []>} : vector<8x8xf32>, vector<8x8xf32>, vector<8x8xf32> -> vector<8x8xf32>
    %cst_43 = arith.constant dense<0xFF800000> : vector<8xf32>
    %110 = vector.multi_reduction <maximumf>, %109, %cst_43 [1] : vector<8x8xf32> to vector<8xf32>
    %111 = vector.shape_cast %110 : vector<8xf32> to vector<8x1xf32>
    %112 = vector.broadcast %111 : vector<8x1xf32> to vector<8x8xf32>
    %113 = arith.subf %109, %112 : vector<8x8xf32>
    %114 = math.exp %113 : vector<8x8xf32>
    %cst_44 = arith.constant dense<0.000000e+00> : vector<8xf32>
    %115 = vector.multi_reduction <add>, %114, %cst_44 [1] : vector<8x8xf32> to vector<8xf32>
    %116 = vector.shape_cast %115 : vector<8xf32> to vector<8x1xf32>
    %117 = tpu.reciprocal %116 {approx = true} : vector<8x1xf32> -> vector<8x1xf32>
    %118 = vector.broadcast %117 : vector<8x1xf32> to vector<8x8xf32>
    %119 = arith.mulf %114, %118 : vector<8x8xf32>
    %120 = vector.extract_strided_slice %106 {offsets = [0, 0], sizes = [8, 8], strides = [1, 1]} : vector<8x32xf32> to vector<8x8xf32>
    %cst_45 = arith.constant dense<0.000000e+00> : vector<8x8xf32>
    %121 = tpu.matmul %119, %120, %cst_45 {dimension_numbers = #tpu.dot_dimension_numbers<[1], [0], [0], [1], [0, 0, 1, 1], [], []>} : vector<8x8xf32>, vector<8x8xf32>, vector<8x8xf32> -> vector<8x8xf32>
    %122 = vector.extract_strided_slice %104 {offsets = [0, 8], sizes = [8, 8], strides = [1, 1]} : vector<8x32xf32> to vector<8x8xf32>
    %123 = vector.extract_strided_slice %105 {offsets = [0, 8], sizes = [8, 8], strides = [1, 1]} : vector<8x32xf32> to vector<8x8xf32>
    %cst_46 = arith.constant dense<0.000000e+00> : vector<8x8xf32>
    %124 = tpu.matmul %122, %123, %cst_46 {dimension_numbers = #tpu.dot_dimension_numbers<[1], [1], [0], [0], [0, 0, 1, 0], [], []>} : vector<8x8xf32>, vector<8x8xf32>, vector<8x8xf32> -> vector<8x8xf32>
    %cst_47 = arith.constant dense<0xFF800000> : vector<8xf32>
    %125 = vector.multi_reduction <maximumf>, %124, %cst_47 [1] : vector<8x8xf32> to vector<8xf32>
    %126 = vector.shape_cast %125 : vector<8xf32> to vector<8x1xf32>
    %127 = vector.broadcast %126 : vector<8x1xf32> to vector<8x8xf32>
    %128 = arith.subf %124, %127 : vector<8x8xf32>
    %129 = math.exp %128 : vector<8x8xf32>
    %cst_48 = arith.constant dense<0.000000e+00> : vector<8xf32>
    %130 = vector.multi_reduction <add>, %129, %cst_48 [1] : vector<8x8xf32> to vector<8xf32>
    %131 = vector.shape_cast %130 : vector<8xf32> to vector<8x1xf32>
    %132 = tpu.reciprocal %131 {approx = true} : vector<8x1xf32> -> vector<8x1xf32>
    %133 = vector.broadcast %132 : vector<8x1xf32> to vector<8x8xf32>
    %134 = arith.mulf %129, %133 : vector<8x8xf32>
    %135 = vector.extract_strided_slice %106 {offsets = [0, 8], sizes = [8, 8], strides = [1, 1]} : vector<8x32xf32> to vector<8x8xf32>
    %cst_49 = arith.constant dense<0.000000e+00> : vector<8x8xf32>
    %136 = tpu.matmul %134, %135, %cst_49 {dimension_numbers = #tpu.dot_dimension_numbers<[1], [0], [0], [1], [0, 0, 1, 1], [], []>} : vector<8x8xf32>, vector<8x8xf32>, vector<8x8xf32> -> vector<8x8xf32>
    %137 = vector.extract_strided_slice %104 {offsets = [0, 16], sizes = [8, 8], strides = [1, 1]} : vector<8x32xf32> to vector<8x8xf32>
    %138 = vector.extract_strided_slice %105 {offsets = [0, 16], sizes = [8, 8], strides = [1, 1]} : vector<8x32xf32> to vector<8x8xf32>
    %cst_50 = arith.constant dense<0.000000e+00> : vector<8x8xf32>
    %139 = tpu.matmul %137, %138, %cst_50 {dimension_numbers = #tpu.dot_dimension_numbers<[1], [1], [0], [0], [0, 0, 1, 0], [], []>} : vector<8x8xf32>, vector<8x8xf32>, vector<8x8xf32> -> vector<8x8xf32>
    %cst_51 = arith.constant dense<0xFF800000> : vector<8xf32>
    %140 = vector.multi_reduction <maximumf>, %139, %cst_51 [1] : vector<8x8xf32> to vector<8xf32>
    %141 = vector.shape_cast %140 : vector<8xf32> to vector<8x1xf32>
    %142 = vector.broadcast %141 : vector<8x1xf32> to vector<8x8xf32>
    %143 = arith.subf %139, %142 : vector<8x8xf32>
    %144 = math.exp %143 : vector<8x8xf32>
    %cst_52 = arith.constant dense<0.000000e+00> : vector<8xf32>
    %145 = vector.multi_reduction <add>, %144, %cst_52 [1] : vector<8x8xf32> to vector<8xf32>
    %146 = vector.shape_cast %145 : vector<8xf32> to vector<8x1xf32>
    %147 = tpu.reciprocal %146 {approx = true} : vector<8x1xf32> -> vector<8x1xf32>
    %148 = vector.broadcast %147 : vector<8x1xf32> to vector<8x8xf32>
    %149 = arith.mulf %144, %148 : vector<8x8xf32>
    %150 = vector.extract_strided_slice %106 {offsets = [0, 16], sizes = [8, 8], strides = [1, 1]} : vector<8x32xf32> to vector<8x8xf32>
    %cst_53 = arith.constant dense<0.000000e+00> : vector<8x8xf32>
    %151 = tpu.matmul %149, %150, %cst_53 {dimension_numbers = #tpu.dot_dimension_numbers<[1], [0], [0], [1], [0, 0, 1, 1], [], []>} : vector<8x8xf32>, vector<8x8xf32>, vector<8x8xf32> -> vector<8x8xf32>
    %152 = vector.extract_strided_slice %104 {offsets = [0, 24], sizes = [8, 8], strides = [1, 1]} : vector<8x32xf32> to vector<8x8xf32>
    %153 = vector.extract_strided_slice %105 {offsets = [0, 24], sizes = [8, 8], strides = [1, 1]} : vector<8x32xf32> to vector<8x8xf32>
    %cst_54 = arith.constant dense<0.000000e+00> : vector<8x8xf32>
    %154 = tpu.matmul %152, %153, %cst_54 {dimension_numbers = #tpu.dot_dimension_numbers<[1], [1], [0], [0], [0, 0, 1, 0], [], []>} : vector<8x8xf32>, vector<8x8xf32>, vector<8x8xf32> -> vector<8x8xf32>
    %cst_55 = arith.constant dense<0xFF800000> : vector<8xf32>
    %155 = vector.multi_reduction <maximumf>, %154, %cst_55 [1] : vector<8x8xf32> to vector<8xf32>
    %156 = vector.shape_cast %155 : vector<8xf32> to vector<8x1xf32>
    %157 = vector.broadcast %156 : vector<8x1xf32> to vector<8x8xf32>
    %158 = arith.subf %154, %157 : vector<8x8xf32>
    %159 = math.exp %158 : vector<8x8xf32>
    %cst_56 = arith.constant dense<0.000000e+00> : vector<8xf32>
    %160 = vector.multi_reduction <add>, %159, %cst_56 [1] : vector<8x8xf32> to vector<8xf32>
    %161 = vector.shape_cast %160 : vector<8xf32> to vector<8x1xf32>
    %162 = tpu.reciprocal %161 {approx = true} : vector<8x1xf32> -> vector<8x1xf32>
    %163 = vector.broadcast %162 : vector<8x1xf32> to vector<8x8xf32>
    %164 = arith.mulf %159, %163 : vector<8x8xf32>
    %165 = vector.extract_strided_slice %106 {offsets = [0, 24], sizes = [8, 8], strides = [1, 1]} : vector<8x32xf32> to vector<8x8xf32>
    %cst_57 = arith.constant dense<0.000000e+00> : vector<8x8xf32>
    %166 = tpu.matmul %164, %165, %cst_57 {dimension_numbers = #tpu.dot_dimension_numbers<[1], [0], [0], [1], [0, 0, 1, 1], [], []>} : vector<8x8xf32>, vector<8x8xf32>, vector<8x8xf32> -> vector<8x8xf32>
    %167 = tpu.concatenate %121, %136, %151, %166 in 1 : vector<8x8xf32>, vector<8x8xf32>, vector<8x8xf32>, vector<8x8xf32> -> vector<8x32xf32>
    %168 = tpu.concatenate %103, %167 in 0 : vector<8x32xf32>, vector<8x32xf32> -> vector<16x32xf32>
    %cst_58 = arith.constant dense<0.000000e+00> : vector<16x32xf32>
    %169 = tpu.matmul %168, %33, %cst_58 {dimension_numbers = #tpu.dot_dimension_numbers<[1], [0], [0], [1], [0, 0, 1, 1], [], []>} : vector<16x32xf32>, vector<32x32xf32>, vector<16x32xf32> -> vector<16x32xf32>
    %170 = vector.broadcast %35 : vector<1x32xf32> to vector<16x32xf32>
    %171 = arith.addf %169, %170 : vector<16x32xf32>
    %172 = arith.addf %3, %171 : vector<16x32xf32>
    %c0_59 = arith.constant 0 : index
    %c0_60 = arith.constant 0 : index
    %c0_61 = arith.constant 0 : index
    %173 = vector.load %arg9[%c0_59, %c0_60, %c0_61] : memref<1x1x32xf32, #tpu.memory_space<vmem>>, vector<1x1x32xf32>
    %174 = vector.shape_cast %173 : vector<1x1x32xf32> to vector<1x32xf32>
    %c0_62 = arith.constant 0 : index
    %c0_63 = arith.constant 0 : index
    %c0_64 = arith.constant 0 : index
    %175 = vector.load %arg10[%c0_62, %c0_63, %c0_64] : memref<1x1x32xf32, #tpu.memory_space<vmem>>, vector<1x1x32xf32>
    %176 = vector.shape_cast %175 : vector<1x1x32xf32> to vector<1x32xf32>
    %cst_65 = arith.constant dense<0.000000e+00> : vector<16xf32>
    %177 = vector.multi_reduction <add>, %172, %cst_65 [1] : vector<16x32xf32> to vector<16xf32>
    %178 = vector.shape_cast %177 : vector<16xf32> to vector<16x1xf32>
    %cst_66 = arith.constant 3.200000e+01 : f32
    %179 = vector.broadcast %cst_66 : f32 to vector<16x1xf32>
    %180 = arith.divf %178, %179 : vector<16x1xf32>
    %181 = vector.broadcast %180 : vector<16x1xf32> to vector<16x32xf32>
    %182 = arith.subf %172, %181 : vector<16x32xf32>
    %183 = arith.mulf %182, %182 : vector<16x32xf32>
    %cst_67 = arith.constant dense<0.000000e+00> : vector<16xf32>
    %184 = vector.multi_reduction <add>, %183, %cst_67 [1] : vector<16x32xf32> to vector<16xf32>
    %185 = vector.shape_cast %184 : vector<16xf32> to vector<16x1xf32>
    %cst_68 = arith.constant 3.200000e+01 : f32
    %186 = vector.broadcast %cst_68 : f32 to vector<16x1xf32>
    %187 = arith.divf %185, %186 : vector<16x1xf32>
    %cst_69 = arith.constant 9.99999974E-6 : f32
    %188 = vector.broadcast %cst_69 : f32 to vector<16x1xf32>
    %189 = arith.addf %187, %188 : vector<16x1xf32>
    %190 = math.rsqrt %189 : vector<16x1xf32>
    %191 = vector.broadcast %190 : vector<16x1xf32> to vector<16x32xf32>
    %192 = arith.mulf %182, %191 : vector<16x32xf32>
    %193 = vector.broadcast %174 : vector<1x32xf32> to vector<16x32xf32>
    %194 = arith.mulf %192, %193 : vector<16x32xf32>
    %195 = vector.broadcast %176 : vector<1x32xf32> to vector<16x32xf32>
    %196 = arith.addf %194, %195 : vector<16x32xf32>
    %c0_70 = arith.constant 0 : index
    %c0_71 = arith.constant 0 : index
    %c0_72 = arith.constant 0 : index
    %197 = vector.load %arg11[%c0_70, %c0_71, %c0_72] : memref<1x32x256xf32, #tpu.memory_space<vmem>>, vector<1x32x256xf32>
    %198 = vector.shape_cast %197 : vector<1x32x256xf32> to vector<32x256xf32>
    %c0_73 = arith.constant 0 : index
    %c0_74 = arith.constant 0 : index
    %c0_75 = arith.constant 0 : index
    %199 = vector.load %arg12[%c0_73, %c0_74, %c0_75] : memref<1x1x256xf32, #tpu.memory_space<vmem>>, vector<1x1x256xf32>
    %200 = vector.shape_cast %199 : vector<1x1x256xf32> to vector<1x256xf32>
    %c0_76 = arith.constant 0 : index
    %c0_77 = arith.constant 0 : index
    %c0_78 = arith.constant 0 : index
    %201 = vector.load %arg13[%c0_76, %c0_77, %c0_78] : memref<1x128x32xf32, #tpu.memory_space<vmem>>, vector<1x128x32xf32>
    %202 = vector.shape_cast %201 : vector<1x128x32xf32> to vector<128x32xf32>
    %c0_79 = arith.constant 0 : index
    %c0_80 = arith.constant 0 : index
    %c0_81 = arith.constant 0 : index
    %203 = vector.load %arg14[%c0_79, %c0_80, %c0_81] : memref<1x1x32xf32, #tpu.memory_space<vmem>>, vector<1x1x32xf32>
    %204 = vector.shape_cast %203 : vector<1x1x32xf32> to vector<1x32xf32>
    %cst_82 = arith.constant dense<0.000000e+00> : vector<16x256xf32>
    %205 = tpu.matmul %196, %198, %cst_82 {dimension_numbers = #tpu.dot_dimension_numbers<[1], [0], [0], [1], [0, 0, 1, 1], [], []>} : vector<16x32xf32>, vector<32x256xf32>, vector<16x256xf32> -> vector<16x256xf32>
    %206 = vector.broadcast %200 : vector<1x256xf32> to vector<16x256xf32>
    %207 = arith.addf %205, %206 : vector<16x256xf32>
    %208 = vector.extract_strided_slice %207 {offsets = [0, 0], sizes = [16, 128], strides = [1, 1]} : vector<16x256xf32> to vector<16x128xf32>
    %209 = vector.extract_strided_slice %207 {offsets = [0, 128], sizes = [16, 128], strides = [1, 1]} : vector<16x256xf32> to vector<16x128xf32>
    %cst_83 = arith.constant 5.000000e-01 : f32
    %210 = vector.broadcast %cst_83 : f32 to vector<16x128xf32>
    %211 = arith.mulf %210, %209 : vector<16x128xf32>
    %cst_84 = arith.constant 0.707106769 : f32
    %212 = vector.broadcast %cst_84 : f32 to vector<16x128xf32>
    %213 = arith.mulf %209, %212 : vector<16x128xf32>
    %214 = math.absf %213 : vector<16x128xf32>
    %cst_85 = arith.constant 5.000000e-01 : f32
    %215 = vector.broadcast %cst_85 : f32 to vector<16x128xf32>
    %216 = arith.mulf %215, %214 : vector<16x128xf32>
    %cst_86 = arith.constant 1.000000e+00 : f32
    %217 = vector.broadcast %cst_86 : f32 to vector<16x128xf32>
    %218 = arith.addf %217, %216 : vector<16x128xf32>
    %cst_87 = arith.constant 1.000000e+00 : f32
    %219 = vector.broadcast %cst_87 : f32 to vector<16x128xf32>
    %220 = arith.divf %219, %218 : vector<16x128xf32>
    %cst_88 = arith.constant 0.170872763 : f32
    %221 = vector.broadcast %cst_88 : f32 to vector<16x128xf32>
    %222 = arith.mulf %220, %221 : vector<16x128xf32>
    %cst_89 = arith.constant -0.822152256 : f32
    %223 = vector.broadcast %cst_89 : f32 to vector<16x128xf32>
    %224 = arith.addf %223, %222 : vector<16x128xf32>
    %225 = arith.mulf %220, %224 : vector<16x128xf32>
    %cst_90 = arith.constant 1.48851585 : f32
    %226 = vector.broadcast %cst_90 : f32 to vector<16x128xf32>
    %227 = arith.addf %226, %225 : vector<16x128xf32>
    %228 = arith.mulf %220, %227 : vector<16x128xf32>
    %cst_91 = arith.constant -1.13520396 : f32
    %229 = vector.broadcast %cst_91 : f32 to vector<16x128xf32>
    %230 = arith.addf %229, %228 : vector<16x128xf32>
    %231 = arith.mulf %220, %230 : vector<16x128xf32>
    %cst_92 = arith.constant 0.278868079 : f32
    %232 = vector.broadcast %cst_92 : f32 to vector<16x128xf32>
    %233 = arith.addf %232, %231 : vector<16x128xf32>
    %234 = arith.mulf %220, %233 : vector<16x128xf32>
    %cst_93 = arith.constant -0.186288059 : f32
    %235 = vector.broadcast %cst_93 : f32 to vector<16x128xf32>
    %236 = arith.addf %235, %234 : vector<16x128xf32>
    %237 = arith.mulf %220, %236 : vector<16x128xf32>
    %cst_94 = arith.constant 0.0967841818 : f32
    %238 = vector.broadcast %cst_94 : f32 to vector<16x128xf32>
    %239 = arith.addf %238, %237 : vector<16x128xf32>
    %240 = arith.mulf %220, %239 : vector<16x128xf32>
    %cst_95 = arith.constant 0.374091953 : f32
    %241 = vector.broadcast %cst_95 : f32 to vector<16x128xf32>
    %242 = arith.addf %241, %240 : vector<16x128xf32>
    %243 = arith.mulf %220, %242 : vector<16x128xf32>
    %cst_96 = arith.constant 1.00002372 : f32
    %244 = vector.broadcast %cst_96 : f32 to vector<16x128xf32>
    %245 = arith.addf %244, %243 : vector<16x128xf32>
    %246 = arith.mulf %220, %245 : vector<16x128xf32>
    %cst_97 = arith.constant -1.26551223 : f32
    %247 = vector.broadcast %cst_97 : f32 to vector<16x128xf32>
    %248 = arith.addf %247, %246 : vector<16x128xf32>
    %cst_98 = arith.constant 0.000000e+00 : f32
    %249 = vector.broadcast %cst_98 : f32 to vector<16x128xf32>
    %250 = arith.subf %249, %214 : vector<16x128xf32>
    %251 = arith.mulf %250, %214 : vector<16x128xf32>
    %252 = arith.addf %251, %248 : vector<16x128xf32>
    %253 = math.exp %252 : vector<16x128xf32>
    %254 = arith.mulf %220, %253 : vector<16x128xf32>
    %cst_99 = arith.constant 0.000000e+00 : f32
    %255 = vector.broadcast %cst_99 : f32 to vector<16x128xf32>
    %256 = arith.cmpf oge, %213, %255 : vector<16x128xf32>
    %cst_100 = arith.constant 1.000000e+00 : f32
    %257 = vector.broadcast %cst_100 : f32 to vector<16x128xf32>
    %258 = arith.subf %257, %254 : vector<16x128xf32>
    %cst_101 = arith.constant 1.000000e+00 : f32
    %259 = vector.broadcast %cst_101 : f32 to vector<16x128xf32>
    %260 = arith.subf %254, %259 : vector<16x128xf32>
    %261 = arith.select %256, %258, %260 : vector<16x128xi1>, vector<16x128xf32>
    %cst_102 = arith.constant 1.000000e+00 : f32
    %262 = vector.broadcast %cst_102 : f32 to vector<16x128xf32>
    %263 = arith.addf %262, %261 : vector<16x128xf32>
    %264 = arith.mulf %211, %263 : vector<16x128xf32>
    %265 = arith.mulf %208, %264 : vector<16x128xf32>
    %cst_103 = arith.constant dense<0.000000e+00> : vector<16x32xf32>
    %266 = tpu.matmul %265, %202, %cst_103 {dimension_numbers = #tpu.dot_dimension_numbers<[1], [0], [0], [1], [0, 0, 1, 1], [], []>} : vector<16x128xf32>, vector<128x32xf32>, vector<16x32xf32> -> vector<16x32xf32>
    %267 = vector.broadcast %204 : vector<1x32xf32> to vector<16x32xf32>
    %268 = arith.addf %266, %267 : vector<16x32xf32>
    %269 = arith.addf %172, %268 : vector<16x32xf32>
    %c0_104 = arith.constant 0 : index
    %c0_105 = arith.constant 0 : index
    %270 = vector.load %arg16[%c0_104, %c0_105] : memref<16x32xf32, #tpu.memory_space<vmem>>, vector<16x32xf32>
    tpu.vector_store %arg16[%c0_104, %c0_105], %269 {strides = array<i32>} : memref<16x32xf32, #tpu.memory_space<vmem>>, vector<16x32xf32>,
    %c1_i32 = arith.constant 1 : i32
    %271 = arith.cmpi eq, %arg1, %c1_i32 : i32
    %272 = arith.extui %271 : i1 to i32
    %c0_i32_106 = arith.constant 0 : i32
    %273 = arith.cmpi ne, %272, %c0_i32_106 : i32
    scf.if %273 {
      %274 = vector.shape_cast %269 : vector<16x32xf32> to vector<2x8x32xf32>
      %c0_107 = arith.constant 0 : index
      %c0_108 = arith.constant 0 : index
      %c0_109 = arith.constant 0 : index
      %275 = vector.load %arg15[%c0_107, %c0_108, %c0_109] : memref<2x8x32xf32, #tpu.memory_space<vmem>>, vector<2x8x32xf32>
      tpu.vector_store %arg15[%c0_107, %c0_108, %c0_109], %274 {strides = array<i32>} : memref<2x8x32xf32, #tpu.memory_space<vmem>>, vector<2x8x32xf32>,
    } else {
    }
    return
  }
  func.func @transform_0(%arg0: i32, %arg1: i32) -> (i32, i32, i32) {
    %c0_i32 = arith.constant 0 : i32
    %c0_i32_0 = arith.constant 0 : i32
    %c0_i32_1 = arith.constant 0 : i32
    return %arg0, %c0_i32, %c0_i32_0 : i32, i32, i32
  }
  func.func @transform_1(%arg0: i32, %arg1: i32) -> (i32, i32, i32) {
    %c0_i32 = arith.constant 0 : i32
    %c0_i32_0 = arith.constant 0 : i32
    %c0_i32_1 = arith.constant 0 : i32
    return %arg1, %c0_i32, %c0_i32_0 : i32, i32, i32
  }
  func.func @transform_2(%arg0: i32, %arg1: i32) -> (i32, i32, i32) {
    %c0_i32 = arith.constant 0 : i32
    %c0_i32_0 = arith.constant 0 : i32
    %c0_i32_1 = arith.constant 0 : i32
    return %arg1, %c0_i32, %c0_i32_0 : i32, i32, i32
  }
  func.func @transform_3(%arg0: i32, %arg1: i32) -> (i32, i32, i32) {
    %c0_i32 = arith.constant 0 : i32
    %c0_i32_0 = arith.constant 0 : i32
    %c0_i32_1 = arith.constant 0 : i32
    return %arg1, %c0_i32, %c0_i32_0 : i32, i32, i32
  }
  func.func @transform_4(%arg0: i32, %arg1: i32) -> (i32, i32, i32) {
    %c0_i32 = arith.constant 0 : i32
    %c0_i32_0 = arith.constant 0 : i32
    %c0_i32_1 = arith.constant 0 : i32
    return %arg1, %c0_i32, %c0_i32_0 : i32, i32, i32
  }
  func.func @transform_5(%arg0: i32, %arg1: i32) -> (i32, i32, i32) {
    %c0_i32 = arith.constant 0 : i32
    %c0_i32_0 = arith.constant 0 : i32
    %c0_i32_1 = arith.constant 0 : i32
    return %arg1, %c0_i32, %c0_i32_0 : i32, i32, i32
  }
  func.func @transform_6(%arg0: i32, %arg1: i32) -> (i32, i32, i32) {
    %c0_i32 = arith.constant 0 : i32
    %c0_i32_0 = arith.constant 0 : i32
    %c0_i32_1 = arith.constant 0 : i32
    return %arg1, %c0_i32, %c0_i32_0 : i32, i32, i32
  }
  func.func @transform_7(%arg0: i32, %arg1: i32) -> (i32, i32, i32) {
    %c0_i32 = arith.constant 0 : i32
    %c0_i32_0 = arith.constant 0 : i32
    %c0_i32_1 = arith.constant 0 : i32
    return %arg1, %c0_i32, %c0_i32_0 : i32, i32, i32
  }
  func.func @transform_8(%arg0: i32, %arg1: i32) -> (i32, i32, i32) {
    %c0_i32 = arith.constant 0 : i32
    %c0_i32_0 = arith.constant 0 : i32
    %c0_i32_1 = arith.constant 0 : i32
    return %arg1, %c0_i32, %c0_i32_0 : i32, i32, i32
  }
  func.func @transform_9(%arg0: i32, %arg1: i32) -> (i32, i32, i32) {
    %c0_i32 = arith.constant 0 : i32
    %c0_i32_0 = arith.constant 0 : i32
    %c0_i32_1 = arith.constant 0 : i32
    return %arg1, %c0_i32, %c0_i32_0 : i32, i32, i32
  }
  func.func @transform_10(%arg0: i32, %arg1: i32) -> (i32, i32, i32) {
    %c0_i32 = arith.constant 0 : i32
    %c0_i32_0 = arith.constant 0 : i32
    %c0_i32_1 = arith.constant 0 : i32
    return %arg1, %c0_i32, %c0_i32_0 : i32, i32, i32
  }
  func.func @transform_11(%arg0: i32, %arg1: i32) -> (i32, i32, i32) {
    %c0_i32 = arith.constant 0 : i32
    %c0_i32_0 = arith.constant 0 : i32
    %c0_i32_1 = arith.constant 0 : i32
    return %arg1, %c0_i32, %c0_i32_0 : i32, i32, i32
  }
  func.func @transform_12(%arg0: i32, %arg1: i32) -> (i32, i32, i32) {
    %c0_i32 = arith.constant 0 : i32
    %c0_i32_0 = arith.constant 0 : i32
    %c0_i32_1 = arith.constant 0 : i32
    return %arg1, %c0_i32, %c0_i32_0 : i32, i32, i32
  }
  func.func @transform_13(%arg0: i32, %arg1: i32) -> (i32, i32, i32) {
    %c0_i32 = arith.constant 0 : i32
    %c0_i32_0 = arith.constant 0 : i32
    %c0_i32_1 = arith.constant 0 : i32
    return %arg0, %c0_i32, %c0_i32_0 : i32, i32, i32
  }
}

</mosaic_0001>

<bundles_post_ra>
// kernel: tpu_custom_call.1
= control target key start
LH: loop header
LB: loop body
LE: loop exit
PB: predicated region body
PF: predicated region fallthrough
CT: control target
= control target key end

     0   :  { %s2938_s0 = inlined_call_operand.hbm [shape: f32[2,8,32], index: 0, kind: input, shape index: {}]   ;;  %s2939_s1 = inlined_call_operand.hbm [shape: f32[2,1,32], index: 1, kind: input, shape index: {}]   ;;  %s2940_s2 = inlined_call_operand.hbm [shape: f32[2,1,32], index: 2, kind: input, shape index: {}]   ;;  %s2941_s3 = inlined_call_operand.vmem [shape: f32[2,32,32], index: 3, kind: input, shape index: {}]   ;;  %s2942_s4 = inlined_call_operand.vmem [shape: f32[2,32,64], index: 4, kind: input, shape index: {}]   ;;  %s2943_s5 = inlined_call_operand.vmem [shape: f32[2,32,32], index: 5, kind: input, shape index: {}]   ;;  %s2944_s6 = inlined_call_operand.vmem [shape: f32[2,1,32], index: 6, kind: input, shape index: {}]   ;;  %s2945_s7 = inlined_call_operand.hbm [shape: f32[2,1,32], index: 7, kind: input, shape index: {}]   ;;  %s2946_s8 = inlined_call_operand.hbm [shape: f32[2,1,32], index: 8, kind: input, shape index: {}]   ;;  %s2947_s9 = inlined_call_operand.vmem [shape: f32[2,32,256], index: 9, kind: input, shape index: {}]   ;;  %s2948_s10 = inlined_call_operand.vmem [shape: f32[2,1,256], index: 10, kind: input, shape index: {}]   ;;  %s2949_s11 = inlined_call_operand.vmem [shape: f32[2,128,32], index: 11, kind: input, shape index: {}]   ;;  %s2950_s12 = inlined_call_operand.vmem [shape: f32[2,1,32], index: 12, kind: input, shape index: {}]   ;;  %s2951_s13 = inlined_call_operand.hbm [shape: f32[2,8,32], index: 13, kind: output, shape index: {}]  }
   0x1   :  { %2955 = sst [smem:[#allocation21_spill]] %s2938_s0 }
   0x2   :  { %2956 = sst [smem:[#allocation22_spill]] %s2939_s1 }
   0x3   :  { %2957 = sst [smem:[#allocation23_spill]] %s2940_s2 }
   0x4   :  { %2958 = sst [smem:[#allocation24_spill]] %s2941_s3 }
   0x5   :  { %2959 = sst [smem:[#allocation25_spill]] %s2942_s4 }
   0x6   :  { %2960 = sst [smem:[#allocation26_spill]] %s2943_s5 }
   0x7   :  { %2961 = sst [smem:[#allocation27_spill]] %s2945_s7 }
   0x8   :  { %2962 = sst [smem:[#allocation28_spill]] %s2947_s9 }
   0x9   :  { %2963 = sst [smem:[#allocation29_spill]] %s2948_s10 }
   0xa   :  { %2964 = sst [smem:[#allocation30_spill]] %s2949_s11 }
   0xb   :  { %2965 = sst [smem:[#allocation31_spill]] %s2950_s12 }
   0xc   :  { %2966 = sst [smem:[#allocation32_spill]] %s2951_s13 }
   0xd   :  { %18 = vsyncpa [#allocation4], 0 }
   0xe   :  { %19 = vsyncpa [#allocation7], 0 }
   0xf   :  { %21 = vsyncpa [#allocation7 + $0x1], 0 }
  0x10   :  { %22 = vsyncpa [#allocation10], 0 }
  0x11   :  { %24 = vsyncpa [#allocation10 + $0x1], 0 }
  0x12   :  { %25 = vsyncpa [#allocation5], 0  ;;  %s2510_s25 = smov 0   ;;  %s2512_s26 = smov 0  }
  0x13   :  { %s2514_s27 = smov 0   ;;  %s2516_s28 = smov 0  }
  0x14   :  { %s2518_s29 = smov 0   ;;  %s2520_s30 = smov 0  }
  0x15 LB: > { %2967 = sst [smem:[#allocation17_spill]] %s2410_s27  ;;  %s40_s14 = sadd.s32 1, %s2418_s29  ;;  %s2422_s30 = sphi %s2520_s30, %s31_s30   ;;  %s2418_s29 = sphi %s2518_s29, %s2999_s29   ;;  %s2414_s28 = sphi %s2516_s28, %s2998_s28   ;;  %s2410_s27 = sphi %s2514_s27, %s2994_s27   ;;  %s2406_s26 = sphi %s2512_s26, %s2997_s26   ;;  %s2402_s25 = sphi %s2510_s25, %s2996_s25  }
  0x16   : > { %2968 = sst [smem:[#allocation18_spill]] %s2422_s30  ;;  %s76_s15 = sadd.s32 1, %s2410_s27 }
  0x17   : > { %p41_p0 = scmp.ge.s32.totalorder %s40_s14, 2  ;;  %p83_p1 = scmp.ne.s32.totalorder %s2410_s27, %s2406_s26 }
  0x18   : > { %p84_p2 = scmp.eq.s32.totalorder %s2422_s30, 0  ;;  %p2058_p4 = scmp.lt.s32.totalorder %s2422_s30, 2 }
  0x19   : > { %s3001_s14 = smov (%p41_p0, %s40_s14), 0  ;;  %s442_s18 = sand.u32 1, %s2422_s30  }
  0x1a   : > { %2969 = sst [smem:[#allocation19_spill]] %s3001_s14  ;;  %p2547_p3 = por %p84_p2, %p83_p1 }
  0x1b   : > { %s73_s17 = ssub.s32 %s2418_s29, %s3001_s14  ;;  %s2556_s19 = sand.u32 1, %s2410_s27  }
  0x1c   : > { %p74_p5 = scmp.eq.s32.totalorder %s73_s17, 0  ;;  %s2971_s1 = sld [smem:[#allocation22_spill]] }
  0x1d   : > { %s445_s13 = scalar_lea.vmem [#allocation6], %s2556_s19  ;;  %p2568_p6 = pnand %p2058_p4, %p2547_p3 }
  0x1e   : > { %s2563_s23 = scalar_select %p74_p5, %s2410_s27, %s76_s15  }
  0x1f   : > { %s452_s12 = sshll.u32 %s445_s13, 4  ;;  %s2974_s7 = sld [smem:[#allocation27_spill]]  ;;  %s453_s12 = int_to_ptr.vmem [resolvable:$true] %s452_s12 }
  0x20   : > { %2972 = sst [smem:[#allocation20_spill]] %s2563_s23  ;;  %s2582_s16 = scalar_lea.sflag [#allocation10], %s442_s18 }
  0x21   : > { %s2588_s20 = sadd.s32 4294967295, %s2422_s30   ;;  %p89_p7 = scmp.ne.s32.totalorder %s2406_s26, %s2402_s25 }
  0x22   : > { %s448_s22 = scalar_lea.hbm %s2971_s1, %s2418_s29  ;;  %s509_s1 = scalar_lea.vmem [#allocation9], %s2556_s19 }
  0x23   : > { %s450_s24 = sshll.u32 %s448_s22, 4  ;;  %s2576_s22 = scalar_lea.sflag [#allocation7], %s442_s18  ;;  %s451_s24 = int_to_ptr.hbm [resolvable:$true] %s450_s24 }
  0x24   : > { %2047 = dma.hbm_to_vmem [thread:$0]  (!%p2568_p6), %s451_s24, 16, %s453_s12, %s2576_s22  }
  0x25   : > { %s512_s15 = scalar_lea.hbm %s2974_s7, %s2418_s29  ;;  %s516_s14 = sshll.u32 %s509_s1, 4  ;;  %s517_s14 = int_to_ptr.vmem [resolvable:$true] %s516_s14 }
  0x26   : > { %s514_s13 = sshll.u32 %s512_s15, 4  ;;  %p90_p8 = scmp.eq.s32.totalorder %s2588_s20, 0  ;;  %s515_s13 = int_to_ptr.hbm [resolvable:$true] %s514_s13 }
  0x27   : > { %2053 = dma.hbm_to_vmem [thread:$0]  (!%p2568_p6), %s515_s13, 16, %s517_s14, %s2582_s16  }
  0x28   : > { %p1957_p9 = scmp.ge.s32.totalorder %s2422_s30, 1  ;;  %p412_p10 = scmp.lt.s32.totalorder %s2422_s30, 3 }
  0x29   : > { %p2597_p11 = por %p90_p8, %p89_p7  ;;  %s2976_s0 = sld [smem:[#allocation21_spill]] }
  0x2a   : > { %p2604_p12 = pnand %p1957_p9, %p412_p10  ;;  %s2424_s25 = smov [#allocation3]  }
  0x2b   : > { %s428_s21 = sshll.u32 %s2424_s25, 4  ;;  %s2978_s2 = sld [smem:[#allocation23_spill]]  ;;  %s429_s21 = int_to_ptr.vmem [resolvable:$true] %s428_s21 }
  0x2c   : > { %p2040_p13 = pneg %p2604_p12  ;;  %s462_s18 = scalar_lea.vmem [#allocation8], %s2556_s19 }
  0x2d   : > { %s2425_s23 = smov 128   ;;  %s2426_s27 = smov 8  }
  0x2e   : > { %p2041_p0 = pnand %p2040_p13, %p90_p8  ;;  %s529_s11 = scalar_lea.hbm %s2946_s8, %s2418_s29 }
  0x2f   : > { %s426_s24 = sshll.u32 %s2976_s0, 4  ;;  %s469_s0 = sshll.u32 %s462_s18, 4  ;;  %s427_s24 = int_to_ptr.hbm [resolvable:$true] %s426_s24  ;;  %s470_s0 = int_to_ptr.vmem [resolvable:$true] %s469_s0 }
  0x30   : > { %2043 = dma.hbm_to_vmem [thread:$0]  (!%p2041_p0), %s427_s24, 256, %s429_s21, [#allocation4], %s2425_s23, %s2425_s23, %s2426_s27  }
  0x31   : > { %s465_s12 = scalar_lea.hbm %s2978_s2, %s2418_s29  ;;  %s531_s10 = sshll.u32 %s529_s11, 4  ;;  %s532_s10 = int_to_ptr.hbm [resolvable:$true] %s531_s10 }
  0x32   : > { %s467_s7 = sshll.u32 %s465_s12, 4  ;;  %s526_s9 = scalar_lea.vmem [#allocation11], %s2556_s19  ;;  %s468_s7 = int_to_ptr.hbm [resolvable:$true] %s467_s7 }
  0x33   : > { %2050 = dma.hbm_to_vmem [thread:$0]  (!%p2568_p6), %s468_s7, 16, %s470_s0, %s2576_s22  }
  0x34   : > { %s533_s15 = sshll.u32 %s526_s9, 4  ;;  %571 = sbr.rel (%p2604_p12) target bundleno = 2408 (0x968), region = 72  ;;  %s534_s15 = int_to_ptr.vmem [resolvable:$true] %s533_s15 }
  0x35   : > { %2056 = dma.hbm_to_vmem [thread:$0]  (!%p2568_p6), %s532_s10, 16, %s534_s15, %s2582_s16  }
  0x39   : > { %2385 = dma.done.wait (%p90_p8), [#allocation4], 256  }
  0x3a   : > { %2387 = vsyncadd (%p90_p8), [#allocation4], 4294967040  ;;  %s578_s0 = sand.u32 1, %s2588_s20   ;;  %s2636_s7 = sand.u32 1, %s2406_s26  }
  0x3b   : > { %s579_s9 = scalar_lea.sflag [#allocation7], %s578_s0 }
  0x3c   : > { %2389 = dma.done.wait (%p2597_p11), %s579_s9, 32  }
  0x3d   : > { %2391 = vsyncadd (%p2597_p11), %s579_s9, 4294967264  ;;  %s597_s27 = scalar_lea.sflag [#allocation10], %s578_s0 }
  0x3e   : > { %2393 = dma.done.wait (%p2597_p11), %s597_s27, 32  }
  0x3f   : > { %2395 = vsyncadd (%p2597_p11), %s597_s27, 4294967264  ;;  %p694_p1 = scmp.lt.s32.totalorder %s2414_s28, 1  ;;  %s2979_s3 = sld [smem:[#allocation24_spill]] }
  0x40   : > { %s2980_s4 = sld [smem:[#allocation25_spill]]  ;;  %p1973_p2 = scmp.ne.s32.totalorder %s2414_s28, 0 }
  0x41   : > { %s2651_s19 = scalar_select %p694_p1, %s2414_s28, 1 }
  0x42   : > { %s2981_s5 = sld [smem:[#allocation26_spill]] }
  0x43   : > { %s2015_s23 = sshll.u32 %s2651_s19, 5  ;;  %s2018_s0 = sshll.u32 %s2651_s19, 6 }
  0x44   : > { %s2982_s17 = sld [smem:[#allocation28_spill]]  ;;  %s1970_s30 = sshll.u32 %s2651_s19, 1 }
  0x45   : > { %s2661_s14 = scalar_lea.vmem %s2979_s3, %s2015_s23  ;;  %s2983_s16 = sld [smem:[#allocation29_spill]] }
  0x46   : > { %s2666_s12 = scalar_lea.vmem %s2980_s4, %s2015_s23  ;;  %s2019_s21 = sshll.u32 %s2651_s19, 7 }
  0x47   : > { %s2984_s2 = sld [smem:[#allocation30_spill]] }
  0x48   : > { %s2671_s15 = scalar_lea.vmem %s2981_s5, %s2015_s23  ;;  %s2985_s25 = sld [smem:[#allocation31_spill]] }
  0x49   : > { %s608_s5 = scalar_lea.vmem [#allocation11], %s2636_s7 }
  0x4a   : > { %s2677_s22 = scalar_lea.vmem %s2982_s17, %s2018_s0  ;;  %733 = sbr.rel (%p1973_p2) target bundleno = 82 (0x52), region = 96 }
  0x4b   : > { %s2683_s10 = scalar_lea.vmem %s2983_s16, %s1970_s30 }
  0x4d   : > { %s2689_s3 = scalar_lea.vmem %s2984_s2, %s2019_s21 }
  0x4e   : > { %s728_s4 = scalar_lea.vmem %s2985_s25, %s2651_s19 }
  0x4f   : > { %v734_v0 = vld [vmem:[#allocation3] sm:$0xff]  ;;  %vm736_vm0 = vcmask 261120   ;;  %v735_v1 = vld [vmem:[#allocation3 + $0x8] sm:$0xff] }
  0x50   : > { %737 = vst.msk [vmem:[#allocation2] sm:$0xff] %vm736_vm0, %v734_v0 }
  0x51   : > { %738 = vst.msk [vmem:[#allocation2 + $0x8] sm:$0xff] %vm736_vm0, %v735_v1 }
  0x52 PF: > { %vm743_vm1 = vcmask 261120   ;;  %v2427_v6 = vmov 32.0   ;;  %v808_v23 = vld [vmem:[%s2661_s14 + $0x18] sm:$0xff]  ;;  %v807_v25 = vld [vmem:[%s2661_s14 + $0x10] sm:$0xff]  ;;  %v806_v27 = vld [vmem:[%s2661_s14 + $0x8] sm:$0xff]  ;;  %s2986_s2 = scalar_lea.vmem [#allocation6], %s2636_s7  ;;  %s2988_s13 = scalar_lea.vmem %s2944_s6, %s2651_s19 }
  0x53   : > { %2132 = vrcp.f32 %v2427_v6  ;;  %v812_v24 = vld [vmem:[%s2666_s12 + $0x18] sm:$0xff]  ;;  %836 = vmatpush.msra.mxu0 %v808_v23  ;;  %v811_v26 = vld [vmem:[%s2666_s12 + $0x10] sm:$0xff]  ;;  %v810_v28 = vld [vmem:[%s2666_s12 + $0x8] sm:$0xff]  ;;  %s2987_s11 = scalar_lea.vmem [#allocation8], %s2636_s7  ;;  %s2428_s30 = smov 120   ;;  %vm870_vm9 = vcmask 64512  }
  0x54   : > { %859 = vmatpush.msra.mxu2 %v812_v24  ;;  %2020 = vmatpush.msra.mxu3 %v812_v24  ;;  %v805_v29 = vld [vmem:[%s2661_s14] sm:$0xff]  ;;  %s2429_s16 = smov 96   ;;  %s2430_s14 = smov 104   ;;  %vm1142_vm10 = vcmask 130048   ;;  %vm1144_vm11 = vcmask 195584  }
  0x55   : > { %837 = vmatpush.msra.mxu0 %v807_v25  ;;  %v809_v30 = vld [vmem:[%s2666_s12] sm:$0xff]  ;;  %s2431_s12 = smov 112   ;;  %s2432_s0 = smov 88  }
  0x56   : > { %860 = vmatpush.msra.mxu2 %v811_v26  ;;  %2021 = vmatpush.msra.mxu3 %v811_v26  ;;  %v2126_v40 = vld [vmem:[%s2986_s2] ss:$0 sm:$0xff]  ;;  %s2433_s9 = smov 80   ;;  %s2434_s27 = smov 72  }
  0x57   : > { %v2697_v2 = vld [vmem:[#allocation2] sm:$0xff]  ;;  %838 = vmatpush.msra.mxu0 %v806_v27  ;;  %s2435_s17 = smov 8   ;;  %s2436_s24 = smov 24  }
  0x58   : > { %v744_v3 = vsel %vm743_vm1, %v2697_v2, 0.0  ;;  %v2701_v4 = vld [vmem:[#allocation2 + $0x8] sm:$0xff]  ;;  %861 = vmatpush.msra.mxu2 %v810_v28  ;;  %2022 = vmatpush.msra.mxu3 %v810_v28  ;;  %v2127_v43 = vld [vmem:[%s2987_s11] ss:$0 sm:$0xff]  ;;  %s2437_s1 = smov 16   ;;  %p2010_p3 = scmp.ne.s32.totalorder %s2414_s28, 1 }
  0x59   : > { %745 = vadd.xlane.f32.xlu0 %v744_v3  ;;  %v747_v5 = vsel %vm743_vm1, %v2701_v4, 0.0  ;;  %v2133_v7 = vpop.eup %2132  ;;  %839 = vmatpush.msra.mxu0 %v805_v29 }
  0x5a   : > { %748 = vadd.xlane.f32.xlu1 %v747_v5  ;;  %v751_v8 = vmul.f32 32.0, %v2133_v7  ;;  %vm755_vm2 = vweird.f32 %v2133_v7  ;;  %862 = vmatpush.msra.mxu2 %v809_v30 }
  0x5b   : > { %2023 = vmatpush.msra.mxu3 %v809_v30 }
  0x5c   : > { %v752_v9 = vsub.f32 1.0, %v751_v8 }
  0x5e   : > { %v753_v10 = vmul.f32 %v2133_v7, %v752_v9 }
  0x60   : > { %v754_v11 = vadd.f32 %v2133_v7, %v753_v10 }
  0x62   : > { %v2705_v12 = vsel %vm755_vm2, %v2133_v7, %v754_v11 }
  0xcc   : > { %v746_v13 = vpop.xlane.xlu0 %745 }
  0xcd   : > { %v757_v14 = vmul.f32 %v2705_v12, %v746_v13  ;;  %v749_v18 = vpop.xlane.xlu1 %748 }
  0xce   : > { %v758_v19 = vmul.f32 %v2705_v12, %v749_v18 }
  0xcf   : > { %v759_v15 = vsub.f32 %v2697_v2, %v757_v14 }
  0xd0   : > { %v760_v20 = vsub.f32 %v2701_v4, %v758_v19 }
  0xd1   : > { %v761_v16 = vmul.f32 %v759_v15, %v759_v15 }
  0xd2   : > { %v762_v21 = vmul.f32 %v760_v20, %v760_v20 }
  0xd3   : > { %v763_v17 = vsel %vm743_vm1, %v761_v16, 0.0 }
  0xd4   : > { %764 = vadd.xlane.f32.xlu0 %v763_v17  ;;  %v766_v22 = vsel %vm743_vm1, %v762_v21, 0.0 }
  0xd5   : > { %767 = vadd.xlane.f32.xlu1 %v766_v22 }
 0x147   : > { %v765_v31 = vpop.xlane.xlu0 %764 }
 0x148   : > { %v769_v32 = vmul.f32 %v765_v31, %v2705_v12  ;;  %v768_v46 = vpop.xlane.xlu1 %767 }
 0x149   : > { %v770_v47 = vmul.f32 %v768_v46, %v2705_v12 }
 0x14a   : > { %v771_v33 = vadd.f32 1e-05, %v769_v32 }
 0x14b   : > { %v772_v48 = vadd.f32 1e-05, %v770_v47 }
 0x14c   : > { %2134 = vrsqrt.f32 %v771_v33  ;;  %vm779_vm4 = vweird.f32 %v771_v33 }
 0x14d   : > { %2136 = vrsqrt.f32 %v772_v48  ;;  %vm789_vm6 = vweird.f32 %v772_v48 }
 0x152   : > { %v2135_v34 = vpop.eup %2134 }
 0x153   : > { %v774_v35 = vmul.f32 %v2135_v34, %v771_v33  ;;  %vm780_vm3 = vweird.f32 %v2135_v34  ;;  %v2137_v49 = vpop.eup %2136 }
 0x154   : > { %vm781_vm5 = vmor %vm779_vm4, %vm780_vm3  ;;  %v784_v50 = vmul.f32 %v2137_v49, %v772_v48  ;;  %vm790_vm7 = vweird.f32 %v2137_v49 }
 0x155   : > { %v775_v36 = vmul.f32 %v2135_v34, %v774_v35  ;;  %vm791_vm8 = vmor %vm789_vm6, %vm790_vm7 }
 0x156   : > { %v785_v51 = vmul.f32 %v2137_v49, %v784_v50 }
 0x157   : > { %v776_v37 = vmul.f32 0.5, %v775_v36 }
 0x158   : > { %v786_v52 = vmul.f32 0.5, %v785_v51 }
 0x159   : > { %v777_v38 = vsub.f32 1.5, %v776_v37 }
 0x15a   : > { %v787_v53 = vsub.f32 1.5, %v786_v52 }
 0x15b   : > { %v778_v39 = vmul.f32 %v2135_v34, %v777_v38 }
 0x15c   : > { %v788_v54 = vmul.f32 %v2137_v49, %v787_v53 }
 0x15d   : > { %v782_v41 = vsel %vm781_vm5, %v2135_v34, %v778_v39 }
 0x15e   : > { %v793_v42 = vmul.f32 %v782_v41, %v759_v15  ;;  %v792_v55 = vsel %vm791_vm8, %v2137_v49, %v788_v54 }
 0x15f   : > { %v794_v56 = vmul.f32 %v792_v55, %v760_v20 }
 0x160   : > { %v798_v44 = vmul.f32 %v2126_v40, %v793_v42 }
 0x161   : > { %v799_v57 = vmul.f32 %v2126_v40, %v794_v56 }
 0x162   : > { %v803_v45 = vadd.f32 %v2127_v43, %v798_v44 }
 0x163   : > { %v804_v58 = vadd.f32 %v2127_v43, %v799_v57 }
 0x164   : > { %1974 = vmatmul.msk.f32.vlgmr.msra.gmra.mxu0 %vm743_vm1, %v803_v45  ;;  %1976 = vmatmul.msk.f32.vlgmr.msra.gmra.mxu2 %vm743_vm1, %v803_v45 }
 0x165   : > { %1977 = vmatmul.msk.f32.vlgmr.msra.gmra.mxu3 %vm743_vm1, %v804_v58 }
 0x16c   : > { %1975 = vmatmul.msk.f32.gmra.mxu0 %vm743_vm1, %v804_v58 }
 0x1e1   : > { %v841_v59 = vpop.f32.mrf.mxu0 }
 0x1e2   : > { %934 = vrot.lane.b32.xlu2 %v841_v59, %s2428_s30 }
 0x1e7   : > { %v2732_v60 = vpop.f32.mrf.mxu2 }
 0x1e8   : > { %936 = vrot.lane.b32.xlu1 %v2732_v60, %s2428_s30  ;;  %908 = vrot.lane.b32.xlu0 %v2732_v60, %s2429_s16  ;;  %v2744_v61 = vpop.f32.mrf.mxu3 }
 0x1e9   : > { %1978 = vmatpush.xpose.msk.msrb.mxu2 %vm870_vm9, %v2732_v60  ;;  %v844_v62 = vpop.f32.mrf.mxu0 }
 0x1ec   : > { %1979 = vmatmul.msk.f32.vlgmr.msrb.gmra.mxu2 %vm870_vm9, %v841_v59 }
 0x1f0   : > { %1066 = vrot.lane.b32.xlu1 %v2732_v60, %s2430_s14  ;;  %1001 = vrot.lane.b32.xlu0 %v2732_v60, %s2431_s12 }
 0x1f8   : > { %1064 = vrot.lane.b32.xlu0 %v841_v59, %s2430_s14  ;;  %1274 = vrot.lane.b32.xlu1 %v844_v62, %s2431_s12 }
 0x200   : > { %1211 = vrot.lane.b32.xlu0 %v2744_v61, %s2428_s30  ;;  %1341 = vrot.lane.b32.xlu1 %v2744_v61, %s2430_s14 }
 0x208   : > { %1339 = vrot.lane.b32.xlu0 %v844_v62, %s2430_s14 }
 0x23c   : > { %v935_v11 = vpop.permute.xlu2 %934 }
 0x25a   : > { %v937_v63 = vpop.permute.xlu1 %936  ;;  %v909_v0 = vpop.permute.xlu0 %908 }
 0x25b   : > { %929 = vmatpush.msrb.mxu3 %v909_v0 }
 0x25d   : > { %1981 = vmatpush.xpose.msk.msra.mxu3 %vm870_vm9, %v937_v63 }
 0x262   : > { %v1067_v1 = vpop.permute.xlu1 %1066  ;;  %v1002_v3 = vpop.permute.xlu0 %1001 }
 0x263   : > { %1987 = vmatpush.xpose.msk.msrb.mxu0 %vm870_vm9, %v1067_v1 }
 0x26a   : > { %v1065_v5 = vpop.permute.xlu0 %1064  ;;  %v1275_v9 = vpop.permute.xlu1 %1274 }
 0x26b   : > { %1988 = vmatmul.msk.f32.vlgmr.msrb.gmra.mxu0 %vm870_vm9, %v1065_v5 }
 0x26f   : > { %v894_v6 = vpop.f32.mrf.mxu2 }
 0x270   : > { %v897_v7 = vsel %vm870_vm9, %v894_v6, -inf }
 0x271   : > { %898 = vmax.xlane.f32.xlu2 %v897_v7 }
 0x272   : > { %v1212_v8 = vpop.permute.xlu0 %1211  ;;  %v1342_v10 = vpop.permute.xlu1 %1341 }
 0x273   : > { %1993 = vmatpush.xpose.msk.msra.mxu0 %vm870_vm9, %v1212_v8 }
 0x277   : > { %1999 = vmatpush.xpose.msk.msrb.mxu0 %vm870_vm9, %v1342_v10 }
 0x27a   : > { %v1340_v26 = vpop.permute.xlu0 %1339 }
 0x289   : > { %999 = vrot.lane.b32.xlu2 %v841_v59, %s2431_s12 }
 0x2e4   : > { %v899_v13 = vpop.xlane.xlu2 %898 }
 0x2e5   : > { %v900_v14 = vsub.f32 %v894_v6, %v899_v13 }
 0x2e7   : > { %v901_v15 = vmul.f32 1.442695, %v900_v14 }
 0x2e8   : > { %v1089_v16 = vpop.f32.mrf.mxu0 }
 0x2e9   : > { %2138 = vpow2.f32 %v901_v15  ;;  %v1092_v17 = vsel %vm870_vm9, %v1089_v16, -inf }
 0x2ea   : > { %1093 = vmax.xlane.f32.xlu0 %v1092_v17 }
 0x2ec   : > { %v1000_v20 = vpop.permute.xlu2 %999 }
 0x2ef   : > { %v2139_v18 = vpop.eup %2138 }
 0x2f0   : > { %v903_v19 = vsel %vm870_vm9, %v2139_v18, 0.0 }
 0x2f1   : > { %904 = vadd.xlane.f32.xlu2 %v903_v19 }
 0x309   : > { %1276 = vrot.lane.b32.xlu2 %v2744_v61, %s2431_s12 }
 0x311   : > { %1209 = vrot.lane.b32.xlu2 %v844_v62, %s2428_s30 }
 0x35d   : > { %v1094_v30 = vpop.xlane.xlu0 %1093 }
 0x35e   : > { %v1095_v31 = vsub.f32 %v1089_v16, %v1094_v30 }
 0x360   : > { %v1096_v34 = vmul.f32 1.442695, %v1095_v31 }
 0x364   : > { %v905_v21 = vpop.xlane.xlu2 %904 }
 0x365   : > { %2140 = vrcp.f32 %v905_v21 }
 0x366   : > { %2142 = vpow2.f32 %v1096_v34 }
 0x36b   : > { %v2141_v22 = vpop.eup %2140 }
 0x36c   : > { %v1277_v23 = vpop.permute.xlu2 %1276  ;;  %v907_v24 = vmul.f32 %v2141_v22, %v2139_v18  ;;  %v2779_v39 = vpop.eup %2142 }
 0x36d   : > { %v1098_v42 = vsel %vm870_vm9, %v2779_v39, 0.0 }
 0x36e   : > { %1980 = vmatmul.msk.f32.vlgmr.msrb.gmra.mxu3 %vm870_vm9, %v907_v24 }
 0x36f   : > { %1984 = vmatpush.xpose.msk.msrb.mxu3 %vm870_vm9, %v1002_v3 }
 0x374   : > { %v1210_v25 = vpop.permute.xlu2 %1209 }
 0x375   : > { %1994 = vmatmul.msk.f32.vlgmr.msra.gmra.mxu0 %vm870_vm9, %v1210_v25 }
 0x376   : > { %1982 = vmatmul.msk.f32.vlgmr.msra.gmra.mxu3 %vm870_vm9, %v935_v11 }
 0x377   : > { %1990 = vmatpush.xpose.msk.msra.mxu3 %vm870_vm9, %v2744_v61 }
 0x37d   : > { %2000 = vmatmul.msk.f32.vlgmr.msrb.gmra.mxu0 %vm870_vm9, %v1340_v26 }
 0x37e   : > { %1985 = vmatmul.msk.f32.vlgmr.msrb.gmra.mxu3 %vm870_vm9, %v1000_v20 }
 0x37f   : > { %1996 = vmatpush.xpose.msk.msrb.mxu3 %vm870_vm9, %v1277_v23 }
 0x386   : > { %1991 = vmatmul.msk.f32.vlgmr.msra.gmra.mxu3 %vm870_vm9, %v844_v62 }
 0x38e   : > { %1997 = vmatmul.msk.f32.vlgmr.msrb.gmra.mxu3 %vm870_vm9, %v1275_v9 }
 0x3f1   : > { %v2773_v27 = vpop.f32.mrf.mxu3 }
 0x3f2   : > { %v1234_v28 = vpop.f32.mrf.mxu0 }
 0x3f3   : > { %v1237_v29 = vsel %vm870_vm9, %v1234_v28, -inf }
 0x3f4   : > { %1238 = vmax.xlane.f32.xlu1 %v1237_v29 }
 0x3f9   : > { %v959_v32 = vpop.f32.mrf.mxu3 }
 0x3fa   : > { %v962_v33 = vsel %vm870_vm9, %v959_v32, -inf  ;;  %v1364_v35 = vpop.f32.mrf.mxu0 }
 0x3fb   : > { %963 = vmax.xlane.f32.xlu2 %v962_v33  ;;  %v1367_v37 = vsel %vm870_vm9, %v1364_v35, -inf }
 0x401   : > { %v1024_v36 = vpop.f32.mrf.mxu3 }
 0x402   : > { %v1027_v38 = vsel %vm870_vm9, %v1024_v36, -inf }
 0x403   : > { %1368 = vmax.xlane.f32.xlu2 %v1367_v37  ;;  %1028 = vmax.xlane.f32.xlu1 %v1027_v38 }
 0x409   : > { %v1169_v40 = vpop.f32.mrf.mxu3 }
 0x40a   : > { %v1172_v41 = vsel %vm870_vm9, %v1169_v40, -inf }
 0x40b   : > { %1173 = vmax.xlane.f32.xlu2 %v1172_v41  ;;  %1099 = vadd.xlane.f32.xlu1 %v1098_v42 }
 0x411   : > { %v1299_v54 = vpop.f32.mrf.mxu3 }
 0x412   : > { %v1302_v58 = vsel %vm870_vm9, %v1299_v54, -inf }
 0x423   : > { %973 = vrot.lane.b32.xlu2 %v2732_v60, %s2432_s0 }
 0x424   : > { %1038 = vrot.lane.b32.xlu1 %v2732_v60, %s2433_s9 }
 0x467   : > { %v1239_v43 = vpop.xlane.xlu1 %1238 }
 0x468   : > { %v1240_v44 = vsub.f32 %v1234_v28, %v1239_v43 }
 0x46a   : > { %v1241_v45 = vmul.f32 1.442695, %v1240_v44 }
 0x46c   : > { %2144 = vpow2.f32 %v1241_v45 }
 0x46e   : > { %v964_v46 = vpop.xlane.xlu2 %963 }
 0x46f   : > { %v965_v47 = vsub.f32 %v959_v32, %v964_v46 }
 0x471   : > { %v966_v48 = vmul.f32 1.442695, %v965_v47 }
 0x472   : > { %v2788_v49 = vpop.eup %2144 }
 0x473   : > { %2146 = vpow2.f32 %v966_v48  ;;  %v1243_v50 = vsel %vm870_vm9, %v2788_v49, 0.0  ;;  %v816_v48 = vld [vmem:[%s2671_s15 + $0x18] sm:$0xff] }
 0x474   : > { %1244 = vadd.xlane.f32.xlu0 %v1243_v50  ;;  %1440 = vmatpush.msra.mxu3 %v816_v48  ;;  %v814_v50 = vld [vmem:[%s2671_s15 + $0x8] sm:$0xff] }
 0x476   : > { %v1369_v51 = vpop.xlane.xlu2 %1368  ;;  %v1029_v52 = vpop.xlane.xlu1 %1028 }
 0x477   : > { %v1030_v53 = vsub.f32 %v1024_v36, %v1029_v52  ;;  %v1370_v9 = vsub.f32 %v1364_v35, %v1369_v51  ;;  %v813_v51 = vld [vmem:[%s2671_s15] sm:$0xff] }
 0x479   : > { %v2147_v55 = vpop.eup %2146  ;;  %v1031_v56 = vmul.f32 1.442695, %v1030_v53  ;;  %v1371_v10 = vmul.f32 1.442695, %v1370_v9 }
 0x47a   : > { %v968_v57 = vsel %vm870_vm9, %v2147_v55, 0.0 }
 0x47b   : > { %969 = vadd.xlane.f32.xlu1 %v968_v57  ;;  %2148 = vpow2.f32 %v1031_v56 }
 0x47c   : > { %1303 = vmax.xlane.f32.xlu0 %v1302_v58 }
 0x47e   : > { %v1174_v59 = vpop.xlane.xlu2 %1173  ;;  %v1100_v7 = vpop.xlane.xlu1 %1099 }
 0x47f   : > { %v1175_v62 = vsub.f32 %v1169_v40, %v1174_v59 }
 0x481   : > { %v1176_v63 = vmul.f32 1.442695, %v1175_v62  ;;  %v2149_v0 = vpop.eup %2148 }
 0x482   : > { %v1033_v1 = vsel %vm870_vm9, %v2149_v0, 0.0 }
 0x483   : > { %2150 = vpow2.f32 %v1176_v63 }
 0x484   : > { %1034 = vadd.xlane.f32.xlu0 %v1033_v1  ;;  %2152 = vpow2.f32 %v1371_v10 }
 0x486   : > { %v974_v3 = vpop.permute.xlu2 %973 }
 0x487   : > { %994 = vmatpush.msra.mxu2 %v974_v3 }
 0x489   : > { %v2151_v5 = vpop.eup %2150 }
 0x48a   : > { %v1178_v6 = vsel %vm870_vm9, %v2151_v5, 0.0  ;;  %v2153_v11 = vpop.eup %2152 }
 0x48b   : > { %v1373_v13 = vsel %vm870_vm9, %v2153_v11, 0.0 }
 0x48c   : > { %1179 = vadd.xlane.f32.xlu0 %v1178_v6  ;;  %v2128_v6 = vld [vmem:[%s2988_s13] ss:$0 sm:$0xff] }
 0x494   : > { %1183 = vrot.lane.b32.xlu1 %v2744_v61, %s2429_s16 }
 0x496   : > { %v1039_v8 = vpop.permute.xlu1 %1038 }
 0x497   : > { %1059 = vmatpush.msrb.mxu2 %v1039_v8 }
 0x49c   : > { %1248 = vrot.lane.b32.xlu1 %v2744_v61, %s2432_s0 }
 0x4a0   : > { %1103 = vrot.lane.b32.xlu0 %v2732_v60, %s2434_s27 }
 0x4a4   : > { %1313 = vrot.lane.b32.xlu1 %v2744_v61, %s2433_s9 }
 0x4ac   : > { %1378 = vrot.lane.b32.xlu1 %v2744_v61, %s2434_s27 }
 0x4ca   : > { %1374 = vadd.xlane.f32.xlu0 %v1373_v13 }
 0x4e7   : > { %v1245_v14 = vpop.xlane.xlu0 %1244 }
 0x4ee   : > { %v970_v15 = vpop.xlane.xlu1 %969 }
 0x4ef   : > { %2154 = vrcp.f32 %v970_v15  ;;  %v1304_v16 = vpop.xlane.xlu0 %1303 }
 0x4f0   : > { %v1305_v17 = vsub.f32 %v1299_v54, %v1304_v16 }
 0x4f2   : > { %v1306_v18 = vmul.f32 1.442695, %v1305_v17 }
 0x4f4   : > { %2156 = vpow2.f32 %v1306_v18 }
 0x4f5   : > { %v2155_v60 = vpop.eup %2154 }
 0x4f6   : > { %v972_v19 = vmul.f32 %v2155_v60, %v2147_v55 }
 0x4f7   : > { %v1035_v20 = vpop.xlane.xlu0 %1034 }
 0x4f8   : > { %2158 = vrcp.f32 %v1035_v20  ;;  %1983 = vmatmul.msk.f32.vlgmr.msra.gmra.mxu2 %vm870_vm9, %v972_v19 }
 0x4fa   : > { %v2157_v61 = vpop.eup %2156 }
 0x4fb   : > { %v1308_v21 = vsel %vm870_vm9, %v2157_v61, 0.0 }
 0x4fc   : > { %1309 = vadd.xlane.f32.xlu2 %v1308_v21  ;;  %v1515_v21 = vld [vmem:[%s2677_s22 + $0x30] sm:$0xff] }
 0x4fe   : > { %v2159_v22 = vpop.eup %2158 }
 0x4ff   : > { %v1037_v23 = vmul.f32 %v2159_v22, %v2149_v0  ;;  %v1180_v24 = vpop.xlane.xlu0 %1179  ;;  %v1516_v22 = vld [vmem:[%s2677_s22 + $0x38] sm:$0xff] }
 0x500   : > { %2160 = vrcp.f32 %v1180_v24  ;;  %1581 = vmatpush.msra.mxu0 %v1516_v22  ;;  %v1514_v24 = vld [vmem:[%s2677_s22 + $0x28] sm:$0xff] }
 0x501   : > { %1986 = vmatmul.msk.f32.vlgmr.msrb.gmra.mxu2 %vm870_vm9, %v1037_v23  ;;  %2162 = vrcp.f32 %v1100_v7  ;;  %v1513_v23 = vld [vmem:[%s2677_s22 + $0x20] sm:$0xff] }
 0x502   : > { %2164 = vrcp.f32 %v1245_v14  ;;  %1582 = vmatpush.msra.mxu0 %v1514_v24 }
 0x506   : > { %v2161_v25 = vpop.eup %2160  ;;  %v1184_v26 = vpop.permute.xlu1 %1183 }
 0x507   : > { %v1182_v28 = vmul.f32 %v2161_v25, %v2151_v5  ;;  %1204 = vmatpush.msra.mxu2 %v1184_v26  ;;  %v2163_v30 = vpop.eup %2162  ;;  %v1511_v25 = vld [vmem:[%s2677_s22 + $0x10] sm:$0xff]  ;;  %v1512_v26 = vld [vmem:[%s2677_s22 + $0x18] sm:$0xff] }
 0x508   : > { %v1102_v32 = vmul.f32 %v2163_v30, %v2779_v39  ;;  %v2165_v34 = vpop.eup %2164  ;;  %1583 = vmatpush.msra.mxu0 %v1512_v26 }
 0x509   : > { %1992 = vmatmul.msk.f32.vlgmr.msra.gmra.mxu2 %vm870_vm9, %v1182_v28  ;;  %v1247_v35 = vmul.f32 %v2165_v34, %v2788_v49  ;;  %v815_v49 = vld [vmem:[%s2671_s15 + $0x10] sm:$0xff]  ;;  %v1509_v28 = vld [vmem:[%s2677_s22] sm:$0xff] }
 0x50a   : > { %1441 = vmatpush.msra.mxu3 %v815_v49 }
 0x50c   : > { %1442 = vmatpush.msra.mxu3 %v814_v50 }
 0x50e   : > { %v1249_v29 = vpop.permute.xlu1 %1248  ;;  %1443 = vmatpush.msra.mxu3 %v813_v51 }
 0x512   : > { %v1104_v31 = vpop.permute.xlu0 %1103 }
 0x513   : > { %1124 = vmatpush.msra.mxu1 %v1104_v31 }
 0x514   : > { %1989 = vmatmul.msk.f32.vlgmr.msra.gmra.mxu1 %vm870_vm9, %v1102_v32 }
 0x515   : > { %1269 = vmatpush.msrb.mxu1 %v1249_v29  ;;  %v1510_v29 = vld [vmem:[%s2677_s22 + $0x8] sm:$0xff]  ;;  %s2989_s22 = scalar_lea.vmem [#allocation9], %s2636_s7 }
 0x516   : > { %v1314_v33 = vpop.permute.xlu1 %1313  ;;  %1584 = vmatpush.msra.mxu0 %v1510_v29 }
 0x517   : > { %1334 = vmatpush.msrb.mxu2 %v1314_v33 }
 0x519   : > { %1558 = vmatpush.msra.mxu2 %v1515_v21  ;;  %v1528_v21 = vld [vmem:[%s2689_s3 + $0x50] sm:$0xff] }
 0x51b   : > { %1559 = vmatpush.msra.mxu2 %v1513_v23  ;;  %v1527_v23 = vld [vmem:[%s2689_s3 + $0x48] sm:$0xff] }
 0x51c   : > { %1995 = vmatmul.msk.f32.vlgmr.msrb.gmra.mxu1 %vm870_vm9, %v1247_v35 }
 0x51d   : > { %1560 = vmatpush.msra.mxu2 %v1511_v25  ;;  %v1526_v25 = vld [vmem:[%s2689_s3 + $0x40] sm:$0xff] }
 0x51e   : > { %v1379_v36 = vpop.permute.xlu1 %1378 }
 0x51f   : > { %1399 = vmatpush.msra.mxu1 %v1379_v36  ;;  %1561 = vmatpush.msra.mxu2 %v1509_v28  ;;  %v1525_v28 = vld [vmem:[%s2689_s3 + $0x38] sm:$0xff] }
 0x53d   : > { %v1375_v37 = vpop.xlane.xlu0 %1374 }
 0x53e   : > { %2166 = vrcp.f32 %v1375_v37 }
 0x544   : > { %v2167_v38 = vpop.eup %2166 }
 0x545   : > { %v1377_v40 = vmul.f32 %v2167_v38, %v2153_v11 }
 0x547   : > { %2001 = vmatmul.msk.f32.vlgmr.msra.gmra.mxu1 %vm870_vm9, %v1377_v40  ;;  %v2129_v40 = vld [vmem:[%s2989_s22] ss:$0 sm:$0xff] }
 0x56f   : > { %v1310_v39 = vpop.xlane.xlu2 %1309 }
 0x570   : > { %2168 = vrcp.f32 %v1310_v39 }
 0x576   : > { %v2169_v41 = vpop.eup %2168 }
 0x577   : > { %v1312_v42 = vmul.f32 %v2169_v41, %v2157_v61 }
 0x579   : > { %1998 = vmatmul.msk.f32.vlgmr.msrb.gmra.mxu2 %vm870_vm9, %v1312_v42  ;;  %v2130_v42 = vld [vmem:[%s608_s5] ss:$0 sm:$0xff] }
 0x57b   : > { %v996_v43 = vpop.f32.mrf.mxu2 }
 0x57c   : > { %1130 = vrot.lane.b32.xlu2 %v996_v43, %s2435_s17 }
 0x584   : > { %v1061_v45 = vpop.f32.mrf.mxu2 }
 0x58c   : > { %v1206_v52 = vpop.f32.mrf.mxu2 }
 0x591   : > { %v1126_v44 = vpop.f32.mrf.mxu1 }
 0x592   : > { %1138 = vrot.lane.b32.xlu1 %v1126_v44, %s2436_s24 }
 0x599   : > { %v1271_v46 = vpop.f32.mrf.mxu1 }
 0x59a   : > { %1134 = vrot.lane.b32.xlu1 %v1061_v45, %s2437_s1  ;;  %1405 = vrot.lane.b32.xlu0 %v1271_v46, %s2435_s17 }
 0x5c4   : > { %v1401_v47 = vpop.f32.mrf.mxu1 }
 0x5c5   : > { %1413 = vrot.lane.b32.xlu2 %v1401_v47, %s2436_s24 }
 0x5d6   : > { %v1131_v55 = vpop.permute.xlu2 %1130 }
 0x5d7   : > { %v1141_v56 = vsel %vm870_vm9, %v2773_v27, %v1131_v55 }
 0x5fc   : > { %v1336_v53 = vpop.f32.mrf.mxu2 }
 0x5fd   : > { %1409 = vrot.lane.b32.xlu1 %v1336_v53, %s2437_s1 }
 0x604   : > { %v1139_v54 = vpop.permute.xlu1 %1138 }
 0x60c   : > { %v1135_v57 = vpop.permute.xlu1 %1134  ;;  %v1406_v62 = vpop.permute.xlu0 %1405 }
 0x60d   : > { %v1143_v58 = vsel %vm1142_vm10, %v1141_v56, %v1135_v57  ;;  %v1416_v63 = vsel %vm870_vm9, %v1206_v52, %v1406_v62 }
 0x60e   : > { %v1145_v59 = vsel %vm1144_vm11, %v1143_v58, %v1139_v54 }
 0x60f   : > { %2002 = vmatmul.msk.f32.vlgmr.msra.gmra.mxu3 %vm743_vm1, %v1145_v59 }
 0x61f   : > { %v1414_v1 = vpop.permute.xlu2 %1413 }
 0x66f   : > { %v1410_v0 = vpop.permute.xlu1 %1409 }
 0x670   : > { %v1417_v3 = vsel %vm1142_vm10, %v1416_v63, %v1410_v0 }
 0x671   : > { %v1418_v5 = vsel %vm1144_vm11, %v1417_v3, %v1414_v1 }
 0x672   : > { %2003 = vmatmul.msk.f32.gmra.mxu3 %vm743_vm1, %v1418_v5 }
 0x692   : > { %v1445_v27 = vpop.f32.mrf.mxu3 }
 0x693   : > { %v1446_v7 = vadd.f32 %v2128_v6, %v1445_v27 }
 0x695   : > { %v2832_v8 = vadd.f32 %v1446_v7, %v2697_v2 }
 0x697   : > { %v1455_v9 = vsel %vm743_vm1, %v2832_v8, 0.0 }
 0x698   : > { %1456 = vadd.xlane.f32.xlu1 %v1455_v9 }
 0x6f5   : > { %v1448_v10 = vpop.f32.mrf.mxu3 }
 0x6f6   : > { %v1449_v11 = vadd.f32 %v2128_v6, %v1448_v10 }
 0x6f8   : > { %v2837_v13 = vadd.f32 %v1449_v11, %v2701_v4  ;;  %v1533_v11 = vld [vmem:[%s2689_s3 + $0x78] sm:$0xff] }
 0x6f9   : > { %1697 = vmatpush.msrb.mxu1 %v1533_v11 }
 0x6fa   : > { %v1458_v14 = vsel %vm743_vm1, %v2837_v13, 0.0 }
 0x6fb   : > { %1459 = vadd.xlane.f32.xlu2 %v1458_v14 }
 0x70b   : > { %v1457_v15 = vpop.xlane.xlu1 %1456 }
 0x70c   : > { %v1461_v2 = vmul.f32 %v1457_v15, %v2705_v12 }
 0x70e   : > { %v1463_v16 = vsub.f32 %v2832_v8, %v1461_v2  ;;  %v1532_v2 = vld [vmem:[%s2689_s3 + $0x70] sm:$0xff] }
 0x70f   : > { %1698 = vmatpush.msrb.mxu1 %v1532_v2 }
 0x710   : > { %v1465_v17 = vmul.f32 %v1463_v16, %v1463_v16 }
 0x712   : > { %v1467_v18 = vsel %vm743_vm1, %v1465_v17, 0.0 }
 0x713   : > { %1468 = vadd.xlane.f32.xlu0 %v1467_v18  ;;  %v1531_v18 = vld [vmem:[%s2689_s3 + $0x68] sm:$0xff] }
 0x714   : > { %1699 = vmatpush.msrb.mxu1 %v1531_v18 }
 0x76e   : > { %v1460_v4 = vpop.xlane.xlu2 %1459 }
 0x76f   : > { %v1462_v60 = vmul.f32 %v1460_v4, %v2705_v12 }
 0x771   : > { %v1464_v19 = vsub.f32 %v2837_v13, %v1462_v60  ;;  %v1530_v60 = vld [vmem:[%s2689_s3 + $0x60] sm:$0xff] }
 0x772   : > { %1700 = vmatpush.msrb.mxu1 %v1530_v60 }
 0x773   : > { %v1466_v20 = vmul.f32 %v1464_v19, %v1464_v19 }
 0x775   : > { %v1470_v61 = vsel %vm743_vm1, %v1466_v20, 0.0  ;;  %v1529_v20 = vld [vmem:[%s2689_s3 + $0x58] sm:$0xff] }
 0x776   : > { %1471 = vadd.xlane.f32.xlu1 %v1470_v61  ;;  %1701 = vmatpush.msrb.mxu1 %v1529_v20 }
 0x778   : > { %1702 = vmatpush.msrb.mxu1 %v1528_v21 }
 0x77a   : > { %1703 = vmatpush.msrb.mxu1 %v1527_v23 }
 0x77c   : > { %1704 = vmatpush.msrb.mxu1 %v1526_v25 }
 0x77e   : > { %1705 = vmatpush.msrb.mxu1 %v1525_v28 }
 0x786   : > { %v1469_v30 = vpop.xlane.xlu0 %1468 }
 0x787   : > { %v1473_v31 = vmul.f32 %v1469_v30, %v2705_v12  ;;  %v1524_v30 = vld [vmem:[%s2689_s3 + $0x30] sm:$0xff] }
 0x788   : > { %1706 = vmatpush.msrb.mxu1 %v1524_v30 }
 0x789   : > { %v1475_v32 = vadd.f32 1e-05, %v1473_v31 }
 0x78b   : > { %2170 = vrsqrt.f32 %v1475_v32  ;;  %vm1483_vm13 = vweird.f32 %v1475_v32 }
 0x791   : > { %v2171_v33 = vpop.eup %2170 }
 0x792   : > { %v1478_v34 = vmul.f32 %v2171_v33, %v1475_v32  ;;  %vm1484_vm12 = vweird.f32 %v2171_v33  ;;  %v1523_v32 = vld [vmem:[%s2689_s3 + $0x28] sm:$0xff] }
 0x793   : > { %vm1485_vm14 = vmor %vm1483_vm13, %vm1484_vm12  ;;  %1707 = vmatpush.msrb.mxu1 %v1523_v32 }
 0x794   : > { %v1479_v35 = vmul.f32 %v2171_v33, %v1478_v34  ;;  %v1522_v34 = vld [vmem:[%s2689_s3 + $0x20] sm:$0xff] }
 0x795   : > { %1708 = vmatpush.msrb.mxu1 %v1522_v34 }
 0x796   : > { %v1480_v36 = vmul.f32 0.5, %v1479_v35 }
 0x798   : > { %v1481_v37 = vsub.f32 1.5, %v1480_v36  ;;  %v1521_v36 = vld [vmem:[%s2689_s3 + $0x18] sm:$0xff] }
 0x799   : > { %1709 = vmatpush.msrb.mxu1 %v1521_v36 }
 0x79a   : > { %v1482_v38 = vmul.f32 %v2171_v33, %v1481_v37 }
 0x79c   : > { %v1486_v39 = vsel %vm1485_vm14, %v2171_v33, %v1482_v38  ;;  %v1520_v38 = vld [vmem:[%s2689_s3 + $0x10] sm:$0xff] }
 0x79d   : > { %v1497_v41 = vmul.f32 %v1486_v39, %v1463_v16  ;;  %1710 = vmatpush.msrb.mxu1 %v1520_v38  ;;  %v1519_v39 = vld [vmem:[%s2689_s3 + $0x8] sm:$0xff] }
 0x79f   : > { %v1502_v43 = vmul.f32 %v2129_v40, %v1497_v41  ;;  %1711 = vmatpush.msrb.mxu1 %v1519_v39 }
 0x7a1   : > { %v1507_v44 = vadd.f32 %v2130_v42, %v1502_v43 }
 0x7a3   : > { %2004 = vmatmul.msk.f32.vlgmr.msra.gmra.mxu2 %vm743_vm1, %v1507_v44  ;;  %2006 = vmatmul.msk.f32.vlgmr.msra.gmra.mxu0 %vm743_vm1, %v1507_v44 }
 0x7e9   : > { %v1472_v45 = vpop.xlane.xlu1 %1471 }
 0x7ea   : > { %v1474_v46 = vmul.f32 %v1472_v45, %v2705_v12  ;;  %v2866_v12 = vld [vmem:[%s2683_s10] sm:$0x3] }
 0x7eb   : > { %v1537_v58 = vperm.slane %v2866_v12, 1 }
 0x7ec   : > { %v1476_v47 = vadd.f32 1e-05, %v1474_v46 }
 0x7ee   : > { %2172 = vrsqrt.f32 %v1476_v47  ;;  %vm1493_vm0 = vweird.f32 %v1476_v47 }
 0x7f4   : > { %v2173_v48 = vpop.eup %2172 }
 0x7f5   : > { %v1488_v49 = vmul.f32 %v2173_v48, %v1476_v47  ;;  %vm1494_vm15 = vweird.f32 %v2173_v48 }
 0x7f6   : > { %vm1495_vm2 = vmor %vm1493_vm0, %vm1494_vm15 }
 0x7f7   : > { %v1489_v50 = vmul.f32 %v2173_v48, %v1488_v49 }
 0x7f9   : > { %v1490_v51 = vmul.f32 0.5, %v1489_v50 }
 0x7fb   : > { %v1491_v52 = vsub.f32 1.5, %v1490_v51 }
 0x7fd   : > { %v1492_v53 = vmul.f32 %v2173_v48, %v1491_v52 }
 0x7ff   : > { %v1496_v54 = vsel %vm1495_vm2, %v2173_v48, %v1492_v53 }
 0x800   : > { %v1498_v55 = vmul.f32 %v1496_v54, %v1464_v19 }
 0x802   : > { %v1503_v56 = vmul.f32 %v2129_v40, %v1498_v55 }
 0x804   : > { %v1508_v57 = vadd.f32 %v2130_v42, %v1503_v56  ;;  %v1518_v42 = vld [vmem:[%s2689_s3] sm:$0xff]  ;;  %v1536_v56 = vperm.slane %v2866_v12, 0 }
 0x805   : > { %1712 = vmatpush.msrb.mxu1 %v1518_v42 }
 0x806   : > { %2005 = vmatmul.msk.f32.gmra.mxu2 %vm743_vm1, %v1508_v57  ;;  %2007 = vmatmul.msk.f32.gmra.mxu0 %vm743_vm1, %v1508_v57 }
 0x820   : > { %v1586_v59 = vpop.f32.mrf.mxu0 }
 0x821   : > { %v2871_v62 = vadd.f32 %v1586_v59, %v1537_v58 }
 0x823   : > { %v2874_v63 = vmul.f32 0.70710677, %v2871_v62 }
 0x825   : > { %v2877_v0 = vand.u32 2147483647, %v2874_v63  ;;  %vm1680_vm7 = vcmp.ge.f32.partialorder %v2874_v63, 0.0 }
 0x826   : > { %v1563_v57 = vpop.f32.mrf.mxu2 }
 0x827   : > { %v1598_v1 = vmul.f32 0.5, %v2877_v0  ;;  %v1668_v46 = vsub.f32 0.0, %v2877_v0 }
 0x829   : > { %v1600_v3 = vadd.f32 1.0, %v1598_v1  ;;  %v1670_v49 = vmul.f32 %v1668_v46, %v2877_v0  ;;  %v1592_v1 = vmul.f32 0.5, %v2871_v62 }
 0x82b   : > { %2174 = vrcp.f32 %v1600_v3  ;;  %v1613_v7 = vand.u32 2147483648, %v1600_v3  ;;  %v1611_v10 = vand.u32 2147483647, %v1600_v3  ;;  %vm1607_vm4 = vweird.f32 %v1600_v3 }
 0x82d   : > { %v1614_v15 = vor.u32 1.1754944e-38, %v1613_v7  ;;  %vm1612_vm6 = vcmp.eq.f32.partialorder %v1611_v10, 8.507059e+37 }
 0x831   : > { %v2175_v5 = vpop.eup %2174 }
 0x832   : > { %v1603_v6 = vmul.f32 %v2175_v5, %v1600_v3  ;;  %vm1608_vm3 = vweird.f32 %v2175_v5 }
 0x833   : > { %vm1609_vm5 = vmor %vm1607_vm4, %vm1608_vm3 }
 0x834   : > { %v1604_v27 = vsub.f32 1.0, %v1603_v6 }
 0x836   : > { %v1605_v9 = vmul.f32 %v2175_v5, %v1604_v27 }
 0x838   : > { %v1606_v14 = vadd.f32 %v2175_v5, %v1605_v9 }
 0x83a   : > { %v1610_v16 = vsel %vm1609_vm5, %v2175_v5, %v1606_v14  ;;  %v1564_v5 = vadd.f32 %v1563_v57, %v1536_v56 }
 0x83b   : > { %v1615_v17 = vsel %vm1612_vm6, %v1614_v15, %v1610_v16 }
 0x83c   : > { %v1632_v4 = vmul.f32 0.17087276, %v1615_v17 }
 0x83e   : > { %v1634_v19 = vadd.f32 -0.82215226, %v1632_v4 }
 0x840   : > { %v1636_v61 = vmul.f32 %v1634_v19, %v1615_v17 }
 0x842   : > { %v1638_v22 = vadd.f32 1.4885159, %v1636_v61 }
 0x844   : > { %v1640_v24 = vmul.f32 %v1638_v22, %v1615_v17 }
 0x846   : > { %v1642_v26 = vadd.f32 -1.135204, %v1640_v24 }
 0x848   : > { %v1644_v29 = vmul.f32 %v1642_v26, %v1615_v17 }
 0x84a   : > { %v1646_v31 = vadd.f32 0.27886808, %v1644_v29 }
 0x84c   : > { %v1648_v33 = vmul.f32 %v1646_v31, %v1615_v17 }
 0x84e   : > { %v1650_v35 = vadd.f32 -0.18628806, %v1648_v33 }
 0x850   : > { %v1652_v37 = vmul.f32 %v1650_v35, %v1615_v17 }
 0x852   : > { %v1654_v40 = vadd.f32 0.09678418, %v1652_v37 }
 0x854   : > { %v1656_v41 = vmul.f32 %v1654_v40, %v1615_v17 }
 0x856   : > { %v1658_v43 = vadd.f32 0.37409195, %v1656_v41 }
 0x858   : > { %v1660_v44 = vmul.f32 %v1658_v43, %v1615_v17 }
 0x85a   : > { %v1662_v45 = vadd.f32 1.0000237, %v1660_v44 }
 0x85c   : > { %v1664_v47 = vmul.f32 %v1662_v45, %v1615_v17 }
 0x85e   : > { %v1666_v48 = vadd.f32 -1.2655122, %v1664_v47 }
 0x860   : > { %v1672_v50 = vadd.f32 %v1670_v49, %v1666_v48 }
 0x862   : > { %v1674_v51 = vmul.f32 1.442695, %v1672_v50 }
 0x864   : > { %2176 = vpow2.f32 %v1674_v51  ;;  %v2131_v51 = vld [vmem:[%s728_s4] ss:$0 sm:$0xff] }
 0x86a   : > { %v2177_v52 = vpop.eup %2176 }
 0x86b   : > { %v1678_v53 = vmul.f32 %v2177_v52, %v1615_v17 }
 0x86d   : > { %v1682_v54 = vsub.f32 1.0, %v1678_v53  ;;  %v2008_v55 = vadd.f32 -1.0, %v1678_v53 }
 0x86f   : > { %v1686_v59 = vsel %vm1680_vm7, %v1682_v54, %v2008_v55 }
 0x870   : > { %v1688_v3 = vadd.f32 1.0, %v1686_v59 }
 0x872   : > { %v1690_v6 = vmul.f32 %v1688_v3, %v1592_v1 }
 0x874   : > { %v1692_v27 = vmul.f32 %v1690_v6, %v1564_v5 }
 0x876   : > { %1713 = vmatmul.f32.vlgmr.msrb.gmra.mxu1 %v1692_v27 }
 0x883   : > { %v1589_v0 = vpop.f32.mrf.mxu0 }
 0x884   : > { %v1590_v7 = vadd.f32 %v1589_v0, %v1537_v58 }
 0x886   : > { %v1595_v9 = vmul.f32 0.70710677, %v1590_v7  ;;  %v1593_v46 = vmul.f32 0.5, %v1590_v7 }
 0x888   : > { %v1597_v10 = vand.u32 2147483647, %v1595_v9  ;;  %vm1681_vm12 = vcmp.ge.f32.partialorder %v1595_v9, 0.0 }
 0x889   : > { %v1566_v44 = vpop.f32.mrf.mxu2 }
 0x88a   : > { %v1599_v11 = vmul.f32 0.5, %v1597_v10  ;;  %v1669_v34 = vsub.f32 0.0, %v1597_v10  ;;  %v1567_v48 = vadd.f32 %v1566_v44, %v1536_v56 }
 0x88c   : > { %v1601_v14 = vadd.f32 1.0, %v1599_v11  ;;  %v1671_v37 = vmul.f32 %v1669_v34, %v1597_v10 }
 0x88e   : > { %2178 = vrcp.f32 %v1601_v14  ;;  %v1628_v16 = vand.u32 2147483648, %v1601_v14  ;;  %v1626_v62 = vand.u32 2147483647, %v1601_v14  ;;  %vm1622_vm9 = vweird.f32 %v1601_v14 }
 0x890   : > { %v1629_v4 = vor.u32 1.1754944e-38, %v1628_v16  ;;  %vm1627_vm11 = vcmp.eq.f32.partialorder %v1626_v62, 8.507059e+37 }
 0x894   : > { %v2179_v63 = vpop.eup %2178 }
 0x895   : > { %v1618_v15 = vmul.f32 %v2179_v63, %v1601_v14  ;;  %vm1623_vm8 = vweird.f32 %v2179_v63 }
 0x896   : > { %vm1624_vm10 = vmor %vm1622_vm9, %vm1623_vm8 }
 0x897   : > { %v1619_v2 = vsub.f32 1.0, %v1618_v15 }
 0x899   : > { %v1620_v17 = vmul.f32 %v2179_v63, %v1619_v2 }
 0x89b   : > { %v1621_v18 = vadd.f32 %v2179_v63, %v1620_v17 }
 0x89d   : > { %v1625_v60 = vsel %vm1624_vm10, %v2179_v63, %v1621_v18 }
 0x89e   : > { %v1630_v12 = vsel %vm1627_vm11, %v1629_v4, %v1625_v60 }
 0x89f   : > { %v1633_v58 = vmul.f32 0.17087276, %v1630_v12 }
 0x8a1   : > { %v1635_v19 = vadd.f32 -0.82215226, %v1633_v58 }
 0x8a3   : > { %v1637_v20 = vmul.f32 %v1635_v19, %v1630_v12 }
 0x8a5   : > { %v1639_v61 = vadd.f32 1.4885159, %v1637_v20 }
 0x8a7   : > { %v1641_v21 = vmul.f32 %v1639_v61, %v1630_v12 }
 0x8a9   : > { %v1643_v22 = vadd.f32 -1.135204, %v1641_v21 }
 0x8ab   : > { %v1645_v23 = vmul.f32 %v1643_v22, %v1630_v12 }
 0x8ad   : > { %v1647_v24 = vadd.f32 0.27886808, %v1645_v23 }
 0x8af   : > { %v1649_v25 = vmul.f32 %v1647_v24, %v1630_v12 }
 0x8b1   : > { %v1651_v26 = vadd.f32 -0.18628806, %v1649_v25 }
 0x8b3   : > { %v1653_v28 = vmul.f32 %v1651_v26, %v1630_v12 }
 0x8b5   : > { %v1655_v29 = vadd.f32 0.09678418, %v1653_v28 }
 0x8b7   : > { %v1657_v30 = vmul.f32 %v1655_v29, %v1630_v12 }
 0x8b9   : > { %v1659_v31 = vadd.f32 0.37409195, %v1657_v30 }
 0x8bb   : > { %v1661_v32 = vmul.f32 %v1659_v31, %v1630_v12 }
 0x8bd   : > { %v1663_v33 = vadd.f32 1.0000237, %v1661_v32 }
 0x8bf   : > { %v1665_v35 = vmul.f32 %v1663_v33, %v1630_v12 }
 0x8c1   : > { %v1667_v36 = vadd.f32 -1.2655122, %v1665_v35 }
 0x8c3   : > { %v1673_v38 = vadd.f32 %v1671_v37, %v1667_v36 }
 0x8c5   : > { %v1676_v40 = vmul.f32 1.442695, %v1673_v38 }
 0x8c7   : > { %2180 = vpow2.f32 %v1676_v40 }
 0x8cd   : > { %v2181_v39 = vpop.eup %2180 }
 0x8ce   : > { %v1679_v41 = vmul.f32 %v2181_v39, %v1630_v12 }
 0x8d0   : > { %v1683_v42 = vsub.f32 1.0, %v1679_v41  ;;  %v2009_v43 = vadd.f32 -1.0, %v1679_v41 }
 0x8d2   : > { %v1687_v45 = vsel %vm1681_vm12, %v1683_v42, %v2009_v43 }
 0x8d3   : > { %v1689_v47 = vadd.f32 1.0, %v1687_v45 }
 0x8d5   : > { %v1691_v49 = vmul.f32 %v1689_v47, %v1593_v46 }
 0x8d7   : > { %v1693_v50 = vmul.f32 %v1691_v49, %v1567_v48 }
 0x8d9   : > { %1716 = vmatmul.f32.gmra.mxu1 %v1693_v50 }
 0x8f3   : > { %v1714_v52 = vpop.f32.mrf.mxu1 }
 0x8f4   : > { %v1715_v53 = vadd.f32 %v2131_v51, %v1714_v52 }
 0x8f6   : > { %v1720_v54 = vadd.f32 %v1715_v53, %v2832_v8 }
 0x8f8   : > { %1722 = vst.msk [vmem:[#allocation2] sm:$0xff] %vm743_vm1, %v1720_v54 }
 0x956   : > { %v1717_v55 = vpop.f32.mrf.mxu1 }
 0x957   : > { %v1718_v57 = vadd.f32 %v2131_v51, %v1717_v55  ;;  %1727 = sbr.rel (%p2010_p3) target bundleno = 2398 (0x95e), region = 100 }
 0x959   : > { %v1721_v59 = vadd.f32 %v1718_v57, %v2837_v13 }
 0x95b   : > { %1723 = vst.msk [vmem:[#allocation2 + $0x8] sm:$0xff] %vm743_vm1, %v1721_v59 }
 0x95c   : > { %1728 = vst.msk [vmem:[#allocation12] sm:$0xff] %vm743_vm1, %v1720_v54 }
 0x95d   : > { %1729 = vst.msk [vmem:[#allocation12 + $0x8] sm:$0xff] %vm743_vm1, %v1721_v59 }
 0x95e PF: > { %p2060_p4 = scmp.eq.s32.totalorder %s2588_s20, 1  ;;  %s2991_s19 = sld [smem:[#allocation32_spill]] }
 0x95f   : > { %s2438_s18 = smov [#allocation12]   ;;  %s2439_s2 = smov 128  }
 0x960   : > { %s1738_s25 = sshll.u32 %s2438_s18, 4  ;;  %s1739_s25 = int_to_ptr.vmem [resolvable:$true] %s1738_s25 }
 0x964   : > { %s1740_s23 = sshll.u32 %s2991_s19, 4  ;;  %s1741_s23 = int_to_ptr.hbm [resolvable:$true] %s1740_s23 }
 0x965   : > { %2037 = dma.vmem_to_hbm [thread:$0]  (%p2060_p4), %s1739_s25, 256, %s1741_s23, [#allocation5], %s2439_s2, %s2439_s2, %s2435_s17  }
 0x966   : > { %2397 = dma.done.wait (%p2060_p4), [#allocation5], 256  }
 0x967   : > { %2399 = vsyncadd (%p2060_p4), [#allocation5], 4294967040 }
 0x968 PF: > { %s2992_s28 = sld [smem:[#allocation18_spill]]  ;;  %s2996_s25 = smov %s2406_s26 }
 0x969   : > { %s2993_s11 = sld [smem:[#allocation17_spill]] }
 0x96a   : > { %s2994_s27 = sld [smem:[#allocation20_spill]] }
 0x96b   : > { %s2995_s20 = sld [smem:[#allocation19_spill]] }
 0x96e   : > { %s31_s30 = sadd.s32 1, %s2992_s28   ;;  %s2998_s28 = smov %s2418_s29 }
 0x96f   : > { %p28_p5 = scmp.ge.s32.totalorder %s31_s30, 4   ;;  %s2997_s26 = smov %s2993_s11 }
 0x971   : > { %s2999_s29 = smov %s2995_s20  ;;  %30 = sbr.rel (!%p28_p5) target bundleno = 21 (0x15), region = 183 }
 0x976   :  { %1757 = vsyncpa [#allocation4], 1 }
 0x977   :  { %1759 = vsyncpa [#allocation4 + $0x1], 1 }
 0x978   :  { %1760 = vsyncpa [#allocation7], 1 }
 0x979   :  { %1762 = vsyncpa [#allocation7 + $0x1], 1 }
 0x97a   :  { %1763 = vsyncpa [#allocation10], 1 }
 0x97b   :  { %1765 = vsyncpa [#allocation10 + $0x1], 1 }
 0x97c   :  { %1766 = vsyncpa [#allocation5], 1 }
 0x97d   :  { %1768 = vsyncpa [#allocation5 + $0x1], 1 }

</bundles_post_ra>
